<compile_context>
chip_gen: v7x
topology: tpu7x:2x2x1
jax: 0.10.0
libtpu: 0.0.40
codegen_flags: <defaults>
</compile_context>

<pallas_src>
import math

import jax
import jax.numpy as jnp
from jax import lax
from jax.experimental import pallas as pl
from jax.experimental.pallas import tpu as pltpu

HIDDEN = 32
NUM_METAPATHS = 5
NUM_HEADS = 8
HEAD_DIM = HIDDEN // NUM_HEADS
LN_EPS = 1e-5

PACK = 4                        # batch rows packed per lane row (4 * 32 = 128 lanes)
GH = PACK * HIDDEN              # 128 packed feature width
DEFAULT_BLOCK_ROWS = 1024       # packed rows per grid step (= 4096 batch rows)

_SQRT_2_OVER_PI = 0.7978845608028654


def _gelu(x):
    # tanh-approx GELU (== nn.GELU(approximate='tanh')); <~1e-3 deviation from exact erf GELU,
    # runs mostly on the otherwise-idle EUP slot.
    return 0.5 * x * (1.0 + jnp.tanh(_SQRT_2_OVER_PI * (x + 0.044715 * x * x * x)))


def _metapath_kernel(show_ref, paths_ref,
                     w1_ref, b1_ref,            # (P, GH, GH) bf16, (P, 1, GH) f32
                     wkv_ref, bkv_ref,          # (P, GH, 2GH) bf16, (P, 1, 2GH) f32  [W2Wk|W2Wv]
                     wshow_ref, bshow_ref,      # (GH, 2GH) bf16, (1, 2GH) f32        [Wq|Wf]
                     wowf_ref,                  # (GH, GH) bf16                        Wo @ Wf
                     gamma_ref, beta_ref,       # (1, GH) f32, (1, GH) f32
                     hsb_ref,                   # (GH, GH) bf16  sum-within-head + broadcast
                     avg_ref,                   # (GH, GH) f32   per-batch-row averaging (LN)
                     out_ref):
    f32 = jnp.float32
    bf16 = jnp.bfloat16
    show = show_ref[...]                        # (bn, GH) bf16 packed rows
    HSB = hsb_ref[...]
    AVG = avg_ref[...]

    # One bf16 MXU pass gives q = show@Wq + bq and y0 = show@Wf + (bo@Wf + bf).
    sp = jnp.dot(show, wshow_ref[...], preferred_element_type=f32) + bshow_ref[...]
    q = sp[:, :GH]
    y0 = sp[:, GH:]

    scale = 1.0 / math.sqrt(HEAD_DIM)
    scores, values = [], []
    for i in range(NUM_METAPATHS):              # unrolled at trace time (P = 5)
        x = paths_ref[:, i * GH:(i + 1) * GH]   # static 128-aligned lane slice, bf16
        h = _gelu(jnp.dot(x, w1_ref[i], preferred_element_type=f32) + b1_ref[i])
        # fused second Linear + k/v projections in a single bf16 (GH, 2GH) matmul
        kv = jnp.dot(h.astype(bf16), wkv_ref[i], preferred_element_type=f32) + bkv_ref[i]
        k = kv[:, :GH]
        v = kv[:, GH:]
        # per-head dot products, directly in broadcast form: every lane of a 4-lane head
        # segment carries that head's score -> (bn, GH)
        s = jnp.dot((q * k).astype(bf16), HSB, preferred_element_type=f32) * scale
        scores.append(s)
        values.append(v)

    # Plain softmax over the P metapaths (f32 max/exp; tiles comfortably fit VMEM).
    m = scores[0]
    for s in scores[1:]:
        m = jnp.maximum(m, s)
    ps = [jnp.exp(s - m) for s in scores]
    denom = ps[0]
    acc = ps[0] * values[0]
    for p, v in zip(ps[1:], values[1:]):
        denom = denom + p
        acc = acc + p * v
    attended = acc / denom                      # exact divide (kernel is memory-bound)

    # y = ((show + attended@Wo + bo) @ Wf + bf), folded as y0 + attended @ (Wo@Wf)
    y = y0 + jnp.dot(attended.astype(bf16), wowf_ref[...], preferred_element_type=f32)

    # LayerNorm over each 32-lane segment (one original batch row); stats via two
    # independent back-to-back f32 MXU dots: var = E[y^2] - mean^2.
    mean = jnp.dot(y, AVG, preferred_element_type=f32)
    ey2 = jnp.dot(y * y, AVG, preferred_element_type=f32)
    var = ey2 - mean * mean
    yn = (y - mean) * lax.rsqrt(var + LN_EPS)
    yn = yn * gamma_ref[...] + beta_ref[...]
    out_ref[...] = _gelu(yn).astype(out_ref.dtype)


def _block_diag(w):
    # (H, H) -> (GH, GH) with PACK copies of w on the diagonal
    return jnp.kron(jnp.eye(PACK, dtype=jnp.float32), w.astype(jnp.float32))


def _tile_bias(b):
    # (1, H) -> (1, GH)
    return jnp.tile(b.astype(jnp.float32), (1, PACK))


def metapath_aggregator(show, paths, params, *, block_rows=None):
    """show: (N, H) f32, paths: (P, N, H) f32, params: dict of unfused weights."""
    N, H = show.shape
    P = paths.shape[0]
    assert H == HIDDEN and P == NUM_METAPATHS
    bf16 = jnp.bfloat16

    # ---- host-side weight fusion / block-diagonal packing (tiny matrices) ----
    w1, b1 = params["w1"], params["b1"]
    w2, b2 = params["w2"], params["b2"]
    wk, bk, wv, bv = params["wk"], params["bk"], params["wv"], params["bv"]
    wq, bq = params["wq"], params["bq"]
    wo, bo = params["wo"], params["bo"]
    wf, bf_ = params["wf"], params["bf"]

    w1_bd = jnp.stack([_block_diag(w1[i]) for i in range(P)]).astype(bf16)        # (P, GH, GH)
    b1_t = jnp.stack([_tile_bias(b1[i]) for i in range(P)])                       # (P, 1, GH) f32

    wkv_bd = jnp.stack([
        jnp.concatenate([_block_diag(w2[i] @ wk), _block_diag(w2[i] @ wv)], axis=1)
        for i in range(P)]).astype(bf16)                                          # (P, GH, 2GH)
    bkv_t = jnp.stack([
        jnp.concatenate([_tile_bias(b2[i] @ wk + bk), _tile_bias(b2[i] @ wv + bv)], axis=1)
        for i in range(P)])                                                       # (P, 1, 2GH)

    wshow = jnp.concatenate([_block_diag(wq), _block_diag(wf)], axis=1).astype(bf16)
    bshow = jnp.concatenate([_tile_bias(bq), _tile_bias(bo @ wf + bf_)], axis=1)  # f32
    wowf_bd = _block_diag(wo @ wf).astype(bf16)                                   # (GH, GH)
    gamma_t = _tile_bias(params["gamma"])
    beta_t = _tile_bias(params["beta"])

    col = jnp.arange(GH)
    # sum-within-head + broadcast-back in one 0/1 matrix (exact in bf16)
    hsb = (col[:, None] // HEAD_DIM == col[None, :] // HEAD_DIM).astype(bf16)     # (GH, GH)
    lnavg = ((col[:, None] // HIDDEN) == (col[None, :] // HIDDEN)).astype(jnp.float32) / HIDDEN

    # ---- pack 4 batch rows per 128-wide lane row, pad, and tile the grid ----
    np_rows = -(-N // PACK)                      # packed rows needed
    if block_rows is None:
        block_rows = DEFAULT_BLOCK_ROWS
    block_rows = max(8, (block_rows // 8) * 8)   # tile rows must be a multiple of 8
    if np_rows <= block_rows:
        # split into (at least) 2 grid steps when possible so the "parallel" axis can
        # shard across v7x's two TensorCores; tiny inputs stay single-step.
        half = -(-np_rows // 2)
        bn = min(block_rows, max(8, -(-half // 8) * 8))
    else:
        bn = block_rows
    np_pad = -(-np_rows // bn) * bn
    pad = np_pad * PACK - N

    show_p = jnp.pad(show, ((0, pad), (0, 0))) if pad else show
    paths_p = jnp.pad(paths, ((0, 0), (0, pad), (0, 0))) if pad else paths
    show_p = show_p.reshape(np_pad, GH).astype(bf16)
    # contiguous (rows, P*GH) slab: row r, lanes [i*128:(i+1)*128] = path i, batch rows 4r..4r+3
    paths_p = jnp.transpose(paths_p.reshape(P, np_pad, GH), (1, 0, 2)).reshape(np_pad, P * GH)
    paths_p = paths_p.astype(bf16)

    def const2(shape):
        return pl.BlockSpec(shape, lambda b: (0, 0))

    def const3(shape):
        return pl.BlockSpec(shape, lambda b: (0, 0, 0))

    in_specs = [
        pl.BlockSpec((bn, GH), lambda b: (b, 0)),           # show (packed, bf16)
        pl.BlockSpec((bn, P * GH), lambda b: (b, 0)),       # metapath slab (packed, bf16)
        const3((P, GH, GH)), const3((P, 1, GH)),            # W1 (block-diag bf16), b1
        const3((P, GH, 2 * GH)), const3((P, 1, 2 * GH)),    # fused [W2Wk|W2Wv], bias
        const2((GH, 2 * GH)), const2((1, 2 * GH)),          # fused [Wq|Wf], bias
        const2((GH, GH)),                                   # fused Wo@Wf
        const2((1, GH)), const2((1, GH)),                   # LN gamma, beta
        const2((GH, GH)),                                   # head sum+broadcast one-hot
        const2((GH, GH)),                                   # LN averaging matrix
    ]
    out_spec = pl.BlockSpec((bn, GH), lambda b: (b, 0))

    fn = pl.pallas_call(
        _metapath_kernel,
        out_shape=jax.ShapeDtypeStruct((np_pad, GH), jnp.float32),
        grid=(np_pad // bn,),
        in_specs=in_specs,
        out_specs=out_spec,
        compiler_params=pltpu.CompilerParams(
            dimension_semantics=("parallel",),
            vmem_limit_bytes=32 * 1024 * 1024,   # sized to need; safe on v5e/v6e/v7x
        ),
    )
    out_p = fn(show_p, paths_p, w1_bd, b1_t, wkv_bd, bkv_t,
               wshow, bshow, wowf_bd, gamma_t, beta_t, hsb, lnavg)
    return out_p.reshape(np_pad * PACK, HIDDEN)[:N]


def init_params(key, hidden=HIDDEN, num_metapaths=NUM_METAPATHS):
    keys = jax.random.split(key, 14)
    s = 0.1

    def mat(k, shape):
        return jax.random.normal(k, shape, jnp.float32) * s

    return {
        "w1": mat(keys[0], (num_metapaths, hidden, hidden)),
        "b1": mat(keys[1], (num_metapaths, 1, hidden)),
        "w2": mat(keys[2], (num_metapaths, hidden, hidden)),
        "b2": mat(keys[3], (num_metapaths, 1, hidden)),
        "wq": mat(keys[4], (hidden, hidden)),
        "bq": mat(keys[5], (1, hidden)),
        "wk": mat(keys[6], (hidden, hidden)),
        "bk": mat(keys[7], (1, hidden)),
        "wv": mat(keys[8], (hidden, hidden)),
        "bv": mat(keys[9], (1, hidden)),
        "wo": mat(keys[10], (hidden, hidden)),
        "bo": mat(keys[11], (1, hidden)),
        "wf": mat(keys[12], (hidden, hidden)),
        "bf": mat(keys[13], (1, hidden)),
        "gamma": jnp.ones((1, hidden), jnp.float32),
        "beta": jnp.zeros((1, hidden), jnp.float32),
    }


def _reference(show, paths, params):
    # Pure-JAX f32 reference with the original (unfused, unpacked) computation order.
    def gelu(x):
        return 0.5 * x * (1.0 + jnp.tanh(_SQRT_2_OVER_PI * (x + 0.044715 * x ** 3)))

    N = show.shape[0]
    q = (show @ params["wq"] + params["bq"]).reshape(N, NUM_HEADS, HEAD_DIM)
    scores, values = [], []
    for i in range(NUM_METAPATHS):
        h = gelu(paths[i] @ params["w1"][i] + params["b1"][i])
        t = h @ params["w2"][i] + params["b2"][i]
        k = (t @ params["wk"] + params["bk"]).reshape(N, NUM_HEADS, HEAD_DIM)
        v = (t @ params["wv"] + params["bv"]).reshape(N, NUM_HEADS, HEAD_DIM)
        scores.append((q * k).sum(-1) / math.sqrt(HEAD_DIM))
        values.append(v)
    s = jnp.stack(scores, axis=-1)                            # (N, NH, P)
    w = jax.nn.softmax(s, axis=-1)
    vals = jnp.stack(values, axis=-1)                         # (N, NH, HD, P)
    attended = jnp.einsum("nhp,nhdp->nhd", w, vals).reshape(N, HIDDEN)
    combined = show + attended @ params["wo"] + params["bo"]
    y = combined @ params["wf"] + params["bf"]
    mean = y.mean(-1, keepdims=True)
    var = ((y - mean) ** 2).mean(-1, keepdims=True)
    yn = (y - mean) / jnp.sqrt(var + LN_EPS) * params["gamma"] + params["beta"]
    return gelu(yn)


if __name__ == "__main__":
    key = jax.random.PRNGKey(0)
    kp, ks, kmp = jax.random.split(key, 3)
    N = 100  # not a multiple of PACK -> exercises padding; small enough, but >1 grid step
    show = jax.random.normal(ks, (N, HIDDEN), jnp.float32)
    paths = jax.random.normal(kmp, (NUM_METAPATHS, N, HIDDEN), jnp.float32)
    params = init_params(kp)

    out = metapath_aggregator(show, paths, params)
    jax.block_until_ready(out)
    assert out.shape == (N, HIDDEN) and out.dtype == jnp.float32

    ref = _reference(show, paths, params)
    err = float(jnp.max(jnp.abs(out - ref)))
    # bf16 matmul operands (f32 accumulation, f32 LN/softmax stats) -> ~1e-2-level deviation.
    assert err < 5e-2, f"kernel/reference mismatch: max abs err = {err}"
    print("KERNEL_OK")
</pallas_src>

<mosaic_0001>
module attributes {stable_mosaic.version = 11 : i64} {
  func.func @_metapath_kernel(%arg0: i32, %arg1: memref<16x128xbf16, #tpu.memory_space<vmem>>, %arg2: memref<16x640xbf16, #tpu.memory_space<vmem>>, %arg3: memref<5x128x128xbf16, #tpu.memory_space<vmem>>, %arg4: memref<5x1x128xf32, #tpu.memory_space<vmem>>, %arg5: memref<5x128x256xbf16, #tpu.memory_space<vmem>>, %arg6: memref<5x1x256xf32, #tpu.memory_space<vmem>>, %arg7: memref<128x256xbf16, #tpu.memory_space<vmem>>, %arg8: memref<1x256xf32, #tpu.memory_space<vmem>>, %arg9: memref<128x128xbf16, #tpu.memory_space<vmem>>, %arg10: memref<1x128xf32, #tpu.memory_space<vmem>>, %arg11: memref<1x128xf32, #tpu.memory_space<vmem>>, %arg12: memref<128x128xbf16, #tpu.memory_space<vmem>>, %arg13: memref<128x128xf32, #tpu.memory_space<vmem>>, %arg14: memref<16x128xf32, #tpu.memory_space<vmem>>) attributes {dimension_semantics = [#tpu.dimension_semantics<parallel>], iteration_bounds = array<i64: 2>, scalar_prefetch = 0 : i64, scratch_operands = 0 : i64, tpu.core_type = #tpu.core_type<tc>, window_params = [{transform_indices = @transform_0, window_bounds = array<i64: 16, 128>}, {transform_indices = @transform_1, window_bounds = array<i64: 16, 640>}, {pipeline_mode = #tpu.pipeline_mode<synchronous>, transform_indices = @transform_2, window_bounds = array<i64: 5, 128, 128>}, {pipeline_mode = #tpu.pipeline_mode<synchronous>, transform_indices = @transform_3, window_bounds = array<i64: 5, 1, 128>}, {pipeline_mode = #tpu.pipeline_mode<synchronous>, transform_indices = @transform_4, window_bounds = array<i64: 5, 128, 256>}, {pipeline_mode = #tpu.pipeline_mode<synchronous>, transform_indices = @transform_5, window_bounds = array<i64: 5, 1, 256>}, {pipeline_mode = #tpu.pipeline_mode<synchronous>, transform_indices = @transform_6, window_bounds = array<i64: 128, 256>}, {pipeline_mode = #tpu.pipeline_mode<synchronous>, transform_indices = @transform_7, window_bounds = array<i64: 1, 256>}, {pipeline_mode = #tpu.pipeline_mode<synchronous>, transform_indices = @transform_8, window_bounds = array<i64: 128, 128>}, {pipeline_mode = #tpu.pipeline_mode<synchronous>, transform_indices = @transform_9, window_bounds = array<i64: 1, 128>}, {pipeline_mode = #tpu.pipeline_mode<synchronous>, transform_indices = @transform_10, window_bounds = array<i64: 1, 128>}, {pipeline_mode = #tpu.pipeline_mode<synchronous>, transform_indices = @transform_11, window_bounds = array<i64: 128, 128>}, {pipeline_mode = #tpu.pipeline_mode<synchronous>, transform_indices = @transform_12, window_bounds = array<i64: 128, 128>}, {transform_indices = @transform_13, window_bounds = array<i64: 16, 128>}]} {
    %c0 = arith.constant 0 : index
    %c0_0 = arith.constant 0 : index
    %0 = vector.load %arg1[%c0, %c0_0] : memref<16x128xbf16, #tpu.memory_space<vmem>>, vector<16x128xbf16>
    %c0_1 = arith.constant 0 : index
    %c0_2 = arith.constant 0 : index
    %1 = vector.load %arg12[%c0_1, %c0_2] : memref<128x128xbf16, #tpu.memory_space<vmem>>, vector<128x128xbf16>
    %c0_3 = arith.constant 0 : index
    %c0_4 = arith.constant 0 : index
    %2 = vector.load %arg13[%c0_3, %c0_4] : memref<128x128xf32, #tpu.memory_space<vmem>>, vector<128x128xf32>
    %c0_5 = arith.constant 0 : index
    %c0_6 = arith.constant 0 : index
    %3 = vector.load %arg7[%c0_5, %c0_6] : memref<128x256xbf16, #tpu.memory_space<vmem>>, vector<128x256xbf16>
    %cst = arith.constant dense<0.000000e+00> : vector<16x256xf32>
    %4 = tpu.matmul %0, %3, %cst {dimension_numbers = #tpu.dot_dimension_numbers<[1], [0], [0], [1], [0, 0, 1, 1], [], []>} : vector<16x128xbf16>, vector<128x256xbf16>, vector<16x256xf32> -> vector<16x256xf32>
    %c0_7 = arith.constant 0 : index
    %c0_8 = arith.constant 0 : index
    %5 = vector.load %arg8[%c0_7, %c0_8] : memref<1x256xf32, #tpu.memory_space<vmem>>, vector<1x256xf32>
    %6 = vector.broadcast %5 : vector<1x256xf32> to vector<16x256xf32>
    %7 = arith.addf %4, %6 : vector<16x256xf32>
    %8 = vector.extract_strided_slice %7 {offsets = [0, 0], sizes = [16, 128], strides = [1, 1]} : vector<16x256xf32> to vector<16x128xf32>
    %9 = vector.extract_strided_slice %7 {offsets = [0, 128], sizes = [16, 128], strides = [1, 1]} : vector<16x256xf32> to vector<16x128xf32>
    %c0_9 = arith.constant 0 : index
    %c0_10 = arith.constant 0 : index
    %10 = vector.load %arg2[%c0_9, %c0_10] : memref<16x640xbf16, #tpu.memory_space<vmem>>, vector<16x128xbf16>
    %c0_11 = arith.constant 0 : index
    %c0_12 = arith.constant 0 : index
    %c0_13 = arith.constant 0 : index
    %11 = vector.load %arg3[%c0_11, %c0_12, %c0_13] : memref<5x128x128xbf16, #tpu.memory_space<vmem>>, vector<1x128x128xbf16>
    %12 = vector.shape_cast %11 : vector<1x128x128xbf16> to vector<128x128xbf16>
    %cst_14 = arith.constant dense<0.000000e+00> : vector<16x128xf32>
    %13 = tpu.matmul %10, %12, %cst_14 {dimension_numbers = #tpu.dot_dimension_numbers<[1], [0], [0], [1], [0, 0, 1, 1], [], []>} : vector<16x128xbf16>, vector<128x128xbf16>, vector<16x128xf32> -> vector<16x128xf32>
    %c0_15 = arith.constant 0 : index
    %c0_16 = arith.constant 0 : index
    %c0_17 = arith.constant 0 : index
    %14 = vector.load %arg4[%c0_15, %c0_16, %c0_17] : memref<5x1x128xf32, #tpu.memory_space<vmem>>, vector<1x1x128xf32>
    %15 = vector.shape_cast %14 : vector<1x1x128xf32> to vector<1x128xf32>
    %16 = vector.broadcast %15 : vector<1x128xf32> to vector<16x128xf32>
    %17 = arith.addf %13, %16 : vector<16x128xf32>
    %cst_18 = arith.constant 5.000000e-01 : f32
    %18 = vector.broadcast %cst_18 : f32 to vector<16x128xf32>
    %19 = arith.mulf %18, %17 : vector<16x128xf32>
    %cst_19 = arith.constant 4.471500e-02 : f32
    %20 = vector.broadcast %cst_19 : f32 to vector<16x128xf32>
    %21 = arith.mulf %20, %17 : vector<16x128xf32>
    %22 = arith.mulf %21, %17 : vector<16x128xf32>
    %23 = arith.mulf %22, %17 : vector<16x128xf32>
    %24 = arith.addf %17, %23 : vector<16x128xf32>
    %cst_20 = arith.constant 0.797884583 : f32
    %25 = vector.broadcast %cst_20 : f32 to vector<16x128xf32>
    %26 = arith.mulf %25, %24 : vector<16x128xf32>
    %27 = math.tanh %26 : vector<16x128xf32>
    %cst_21 = arith.constant 1.000000e+00 : f32
    %28 = vector.broadcast %cst_21 : f32 to vector<16x128xf32>
    %29 = arith.addf %28, %27 : vector<16x128xf32>
    %30 = arith.mulf %19, %29 : vector<16x128xf32>
    %31 = arith.truncf %30 : vector<16x128xf32> to vector<16x128xbf16>
    %c0_22 = arith.constant 0 : index
    %c0_23 = arith.constant 0 : index
    %c0_24 = arith.constant 0 : index
    %32 = vector.load %arg5[%c0_22, %c0_23, %c0_24] : memref<5x128x256xbf16, #tpu.memory_space<vmem>>, vector<1x128x256xbf16>
    %33 = vector.shape_cast %32 : vector<1x128x256xbf16> to vector<128x256xbf16>
    %cst_25 = arith.constant dense<0.000000e+00> : vector<16x256xf32>
    %34 = tpu.matmul %31, %33, %cst_25 {dimension_numbers = #tpu.dot_dimension_numbers<[1], [0], [0], [1], [0, 0, 1, 1], [], []>} : vector<16x128xbf16>, vector<128x256xbf16>, vector<16x256xf32> -> vector<16x256xf32>
    %c0_26 = arith.constant 0 : index
    %c0_27 = arith.constant 0 : index
    %c0_28 = arith.constant 0 : index
    %35 = vector.load %arg6[%c0_26, %c0_27, %c0_28] : memref<5x1x256xf32, #tpu.memory_space<vmem>>, vector<1x1x256xf32>
    %36 = vector.shape_cast %35 : vector<1x1x256xf32> to vector<1x256xf32>
    %37 = vector.broadcast %36 : vector<1x256xf32> to vector<16x256xf32>
    %38 = arith.addf %34, %37 : vector<16x256xf32>
    %39 = vector.extract_strided_slice %38 {offsets = [0, 0], sizes = [16, 128], strides = [1, 1]} : vector<16x256xf32> to vector<16x128xf32>
    %40 = vector.extract_strided_slice %38 {offsets = [0, 128], sizes = [16, 128], strides = [1, 1]} : vector<16x256xf32> to vector<16x128xf32>
    %41 = arith.mulf %8, %39 : vector<16x128xf32>
    %42 = arith.truncf %41 : vector<16x128xf32> to vector<16x128xbf16>
    %cst_29 = arith.constant dense<0.000000e+00> : vector<16x128xf32>
    %43 = tpu.matmul %42, %1, %cst_29 {dimension_numbers = #tpu.dot_dimension_numbers<[1], [0], [0], [1], [0, 0, 1, 1], [], []>} : vector<16x128xbf16>, vector<128x128xbf16>, vector<16x128xf32> -> vector<16x128xf32>
    %cst_30 = arith.constant 5.000000e-01 : f32
    %44 = vector.broadcast %cst_30 : f32 to vector<16x128xf32>
    %45 = arith.mulf %43, %44 : vector<16x128xf32>
    %c0_31 = arith.constant 0 : index
    %c128 = arith.constant 128 : index
    %46 = vector.load %arg2[%c0_31, %c128] : memref<16x640xbf16, #tpu.memory_space<vmem>>, vector<16x128xbf16>
    %c1 = arith.constant 1 : index
    %c0_32 = arith.constant 0 : index
    %c0_33 = arith.constant 0 : index
    %47 = vector.load %arg3[%c1, %c0_32, %c0_33] : memref<5x128x128xbf16, #tpu.memory_space<vmem>>, vector<1x128x128xbf16>
    %48 = vector.shape_cast %47 : vector<1x128x128xbf16> to vector<128x128xbf16>
    %cst_34 = arith.constant dense<0.000000e+00> : vector<16x128xf32>
    %49 = tpu.matmul %46, %48, %cst_34 {dimension_numbers = #tpu.dot_dimension_numbers<[1], [0], [0], [1], [0, 0, 1, 1], [], []>} : vector<16x128xbf16>, vector<128x128xbf16>, vector<16x128xf32> -> vector<16x128xf32>
    %c1_35 = arith.constant 1 : index
    %c0_36 = arith.constant 0 : index
    %c0_37 = arith.constant 0 : index
    %50 = vector.load %arg4[%c1_35, %c0_36, %c0_37] : memref<5x1x128xf32, #tpu.memory_space<vmem>>, vector<1x1x128xf32>
    %51 = vector.shape_cast %50 : vector<1x1x128xf32> to vector<1x128xf32>
    %52 = vector.broadcast %51 : vector<1x128xf32> to vector<16x128xf32>
    %53 = arith.addf %49, %52 : vector<16x128xf32>
    %cst_38 = arith.constant 5.000000e-01 : f32
    %54 = vector.broadcast %cst_38 : f32 to vector<16x128xf32>
    %55 = arith.mulf %54, %53 : vector<16x128xf32>
    %cst_39 = arith.constant 4.471500e-02 : f32
    %56 = vector.broadcast %cst_39 : f32 to vector<16x128xf32>
    %57 = arith.mulf %56, %53 : vector<16x128xf32>
    %58 = arith.mulf %57, %53 : vector<16x128xf32>
    %59 = arith.mulf %58, %53 : vector<16x128xf32>
    %60 = arith.addf %53, %59 : vector<16x128xf32>
    %cst_40 = arith.constant 0.797884583 : f32
    %61 = vector.broadcast %cst_40 : f32 to vector<16x128xf32>
    %62 = arith.mulf %61, %60 : vector<16x128xf32>
    %63 = math.tanh %62 : vector<16x128xf32>
    %cst_41 = arith.constant 1.000000e+00 : f32
    %64 = vector.broadcast %cst_41 : f32 to vector<16x128xf32>
    %65 = arith.addf %64, %63 : vector<16x128xf32>
    %66 = arith.mulf %55, %65 : vector<16x128xf32>
    %67 = arith.truncf %66 : vector<16x128xf32> to vector<16x128xbf16>
    %c1_42 = arith.constant 1 : index
    %c0_43 = arith.constant 0 : index
    %c0_44 = arith.constant 0 : index
    %68 = vector.load %arg5[%c1_42, %c0_43, %c0_44] : memref<5x128x256xbf16, #tpu.memory_space<vmem>>, vector<1x128x256xbf16>
    %69 = vector.shape_cast %68 : vector<1x128x256xbf16> to vector<128x256xbf16>
    %cst_45 = arith.constant dense<0.000000e+00> : vector<16x256xf32>
    %70 = tpu.matmul %67, %69, %cst_45 {dimension_numbers = #tpu.dot_dimension_numbers<[1], [0], [0], [1], [0, 0, 1, 1], [], []>} : vector<16x128xbf16>, vector<128x256xbf16>, vector<16x256xf32> -> vector<16x256xf32>
    %c1_46 = arith.constant 1 : index
    %c0_47 = arith.constant 0 : index
    %c0_48 = arith.constant 0 : index
    %71 = vector.load %arg6[%c1_46, %c0_47, %c0_48] : memref<5x1x256xf32, #tpu.memory_space<vmem>>, vector<1x1x256xf32>
    %72 = vector.shape_cast %71 : vector<1x1x256xf32> to vector<1x256xf32>
    %73 = vector.broadcast %72 : vector<1x256xf32> to vector<16x256xf32>
    %74 = arith.addf %70, %73 : vector<16x256xf32>
    %75 = vector.extract_strided_slice %74 {offsets = [0, 0], sizes = [16, 128], strides = [1, 1]} : vector<16x256xf32> to vector<16x128xf32>
    %76 = vector.extract_strided_slice %74 {offsets = [0, 128], sizes = [16, 128], strides = [1, 1]} : vector<16x256xf32> to vector<16x128xf32>
    %77 = arith.mulf %8, %75 : vector<16x128xf32>
    %78 = arith.truncf %77 : vector<16x128xf32> to vector<16x128xbf16>
    %cst_49 = arith.constant dense<0.000000e+00> : vector<16x128xf32>
    %79 = tpu.matmul %78, %1, %cst_49 {dimension_numbers = #tpu.dot_dimension_numbers<[1], [0], [0], [1], [0, 0, 1, 1], [], []>} : vector<16x128xbf16>, vector<128x128xbf16>, vector<16x128xf32> -> vector<16x128xf32>
    %cst_50 = arith.constant 5.000000e-01 : f32
    %80 = vector.broadcast %cst_50 : f32 to vector<16x128xf32>
    %81 = arith.mulf %79, %80 : vector<16x128xf32>
    %c0_51 = arith.constant 0 : index
    %c256 = arith.constant 256 : index
    %82 = vector.load %arg2[%c0_51, %c256] : memref<16x640xbf16, #tpu.memory_space<vmem>>, vector<16x128xbf16>
    %c2 = arith.constant 2 : index
    %c0_52 = arith.constant 0 : index
    %c0_53 = arith.constant 0 : index
    %83 = vector.load %arg3[%c2, %c0_52, %c0_53] : memref<5x128x128xbf16, #tpu.memory_space<vmem>>, vector<1x128x128xbf16>
    %84 = vector.shape_cast %83 : vector<1x128x128xbf16> to vector<128x128xbf16>
    %cst_54 = arith.constant dense<0.000000e+00> : vector<16x128xf32>
    %85 = tpu.matmul %82, %84, %cst_54 {dimension_numbers = #tpu.dot_dimension_numbers<[1], [0], [0], [1], [0, 0, 1, 1], [], []>} : vector<16x128xbf16>, vector<128x128xbf16>, vector<16x128xf32> -> vector<16x128xf32>
    %c2_55 = arith.constant 2 : index
    %c0_56 = arith.constant 0 : index
    %c0_57 = arith.constant 0 : index
    %86 = vector.load %arg4[%c2_55, %c0_56, %c0_57] : memref<5x1x128xf32, #tpu.memory_space<vmem>>, vector<1x1x128xf32>
    %87 = vector.shape_cast %86 : vector<1x1x128xf32> to vector<1x128xf32>
    %88 = vector.broadcast %87 : vector<1x128xf32> to vector<16x128xf32>
    %89 = arith.addf %85, %88 : vector<16x128xf32>
    %cst_58 = arith.constant 5.000000e-01 : f32
    %90 = vector.broadcast %cst_58 : f32 to vector<16x128xf32>
    %91 = arith.mulf %90, %89 : vector<16x128xf32>
    %cst_59 = arith.constant 4.471500e-02 : f32
    %92 = vector.broadcast %cst_59 : f32 to vector<16x128xf32>
    %93 = arith.mulf %92, %89 : vector<16x128xf32>
    %94 = arith.mulf %93, %89 : vector<16x128xf32>
    %95 = arith.mulf %94, %89 : vector<16x128xf32>
    %96 = arith.addf %89, %95 : vector<16x128xf32>
    %cst_60 = arith.constant 0.797884583 : f32
    %97 = vector.broadcast %cst_60 : f32 to vector<16x128xf32>
    %98 = arith.mulf %97, %96 : vector<16x128xf32>
    %99 = math.tanh %98 : vector<16x128xf32>
    %cst_61 = arith.constant 1.000000e+00 : f32
    %100 = vector.broadcast %cst_61 : f32 to vector<16x128xf32>
    %101 = arith.addf %100, %99 : vector<16x128xf32>
    %102 = arith.mulf %91, %101 : vector<16x128xf32>
    %103 = arith.truncf %102 : vector<16x128xf32> to vector<16x128xbf16>
    %c2_62 = arith.constant 2 : index
    %c0_63 = arith.constant 0 : index
    %c0_64 = arith.constant 0 : index
    %104 = vector.load %arg5[%c2_62, %c0_63, %c0_64] : memref<5x128x256xbf16, #tpu.memory_space<vmem>>, vector<1x128x256xbf16>
    %105 = vector.shape_cast %104 : vector<1x128x256xbf16> to vector<128x256xbf16>
    %cst_65 = arith.constant dense<0.000000e+00> : vector<16x256xf32>
    %106 = tpu.matmul %103, %105, %cst_65 {dimension_numbers = #tpu.dot_dimension_numbers<[1], [0], [0], [1], [0, 0, 1, 1], [], []>} : vector<16x128xbf16>, vector<128x256xbf16>, vector<16x256xf32> -> vector<16x256xf32>
    %c2_66 = arith.constant 2 : index
    %c0_67 = arith.constant 0 : index
    %c0_68 = arith.constant 0 : index
    %107 = vector.load %arg6[%c2_66, %c0_67, %c0_68] : memref<5x1x256xf32, #tpu.memory_space<vmem>>, vector<1x1x256xf32>
    %108 = vector.shape_cast %107 : vector<1x1x256xf32> to vector<1x256xf32>
    %109 = vector.broadcast %108 : vector<1x256xf32> to vector<16x256xf32>
    %110 = arith.addf %106, %109 : vector<16x256xf32>
    %111 = vector.extract_strided_slice %110 {offsets = [0, 0], sizes = [16, 128], strides = [1, 1]} : vector<16x256xf32> to vector<16x128xf32>
    %112 = vector.extract_strided_slice %110 {offsets = [0, 128], sizes = [16, 128], strides = [1, 1]} : vector<16x256xf32> to vector<16x128xf32>
    %113 = arith.mulf %8, %111 : vector<16x128xf32>
    %114 = arith.truncf %113 : vector<16x128xf32> to vector<16x128xbf16>
    %cst_69 = arith.constant dense<0.000000e+00> : vector<16x128xf32>
    %115 = tpu.matmul %114, %1, %cst_69 {dimension_numbers = #tpu.dot_dimension_numbers<[1], [0], [0], [1], [0, 0, 1, 1], [], []>} : vector<16x128xbf16>, vector<128x128xbf16>, vector<16x128xf32> -> vector<16x128xf32>
    %cst_70 = arith.constant 5.000000e-01 : f32
    %116 = vector.broadcast %cst_70 : f32 to vector<16x128xf32>
    %117 = arith.mulf %115, %116 : vector<16x128xf32>
    %c0_71 = arith.constant 0 : index
    %c384 = arith.constant 384 : index
    %118 = vector.load %arg2[%c0_71, %c384] : memref<16x640xbf16, #tpu.memory_space<vmem>>, vector<16x128xbf16>
    %c3 = arith.constant 3 : index
    %c0_72 = arith.constant 0 : index
    %c0_73 = arith.constant 0 : index
    %119 = vector.load %arg3[%c3, %c0_72, %c0_73] : memref<5x128x128xbf16, #tpu.memory_space<vmem>>, vector<1x128x128xbf16>
    %120 = vector.shape_cast %119 : vector<1x128x128xbf16> to vector<128x128xbf16>
    %cst_74 = arith.constant dense<0.000000e+00> : vector<16x128xf32>
    %121 = tpu.matmul %118, %120, %cst_74 {dimension_numbers = #tpu.dot_dimension_numbers<[1], [0], [0], [1], [0, 0, 1, 1], [], []>} : vector<16x128xbf16>, vector<128x128xbf16>, vector<16x128xf32> -> vector<16x128xf32>
    %c3_75 = arith.constant 3 : index
    %c0_76 = arith.constant 0 : index
    %c0_77 = arith.constant 0 : index
    %122 = vector.load %arg4[%c3_75, %c0_76, %c0_77] : memref<5x1x128xf32, #tpu.memory_space<vmem>>, vector<1x1x128xf32>
    %123 = vector.shape_cast %122 : vector<1x1x128xf32> to vector<1x128xf32>
    %124 = vector.broadcast %123 : vector<1x128xf32> to vector<16x128xf32>
    %125 = arith.addf %121, %124 : vector<16x128xf32>
    %cst_78 = arith.constant 5.000000e-01 : f32
    %126 = vector.broadcast %cst_78 : f32 to vector<16x128xf32>
    %127 = arith.mulf %126, %125 : vector<16x128xf32>
    %cst_79 = arith.constant 4.471500e-02 : f32
    %128 = vector.broadcast %cst_79 : f32 to vector<16x128xf32>
    %129 = arith.mulf %128, %125 : vector<16x128xf32>
    %130 = arith.mulf %129, %125 : vector<16x128xf32>
    %131 = arith.mulf %130, %125 : vector<16x128xf32>
    %132 = arith.addf %125, %131 : vector<16x128xf32>
    %cst_80 = arith.constant 0.797884583 : f32
    %133 = vector.broadcast %cst_80 : f32 to vector<16x128xf32>
    %134 = arith.mulf %133, %132 : vector<16x128xf32>
    %135 = math.tanh %134 : vector<16x128xf32>
    %cst_81 = arith.constant 1.000000e+00 : f32
    %136 = vector.broadcast %cst_81 : f32 to vector<16x128xf32>
    %137 = arith.addf %136, %135 : vector<16x128xf32>
    %138 = arith.mulf %127, %137 : vector<16x128xf32>
    %139 = arith.truncf %138 : vector<16x128xf32> to vector<16x128xbf16>
    %c3_82 = arith.constant 3 : index
    %c0_83 = arith.constant 0 : index
    %c0_84 = arith.constant 0 : index
    %140 = vector.load %arg5[%c3_82, %c0_83, %c0_84] : memref<5x128x256xbf16, #tpu.memory_space<vmem>>, vector<1x128x256xbf16>
    %141 = vector.shape_cast %140 : vector<1x128x256xbf16> to vector<128x256xbf16>
    %cst_85 = arith.constant dense<0.000000e+00> : vector<16x256xf32>
    %142 = tpu.matmul %139, %141, %cst_85 {dimension_numbers = #tpu.dot_dimension_numbers<[1], [0], [0], [1], [0, 0, 1, 1], [], []>} : vector<16x128xbf16>, vector<128x256xbf16>, vector<16x256xf32> -> vector<16x256xf32>
    %c3_86 = arith.constant 3 : index
    %c0_87 = arith.constant 0 : index
    %c0_88 = arith.constant 0 : index
    %143 = vector.load %arg6[%c3_86, %c0_87, %c0_88] : memref<5x1x256xf32, #tpu.memory_space<vmem>>, vector<1x1x256xf32>
    %144 = vector.shape_cast %143 : vector<1x1x256xf32> to vector<1x256xf32>
    %145 = vector.broadcast %144 : vector<1x256xf32> to vector<16x256xf32>
    %146 = arith.addf %142, %145 : vector<16x256xf32>
    %147 = vector.extract_strided_slice %146 {offsets = [0, 0], sizes = [16, 128], strides = [1, 1]} : vector<16x256xf32> to vector<16x128xf32>
    %148 = vector.extract_strided_slice %146 {offsets = [0, 128], sizes = [16, 128], strides = [1, 1]} : vector<16x256xf32> to vector<16x128xf32>
    %149 = arith.mulf %8, %147 : vector<16x128xf32>
    %150 = arith.truncf %149 : vector<16x128xf32> to vector<16x128xbf16>
    %cst_89 = arith.constant dense<0.000000e+00> : vector<16x128xf32>
    %151 = tpu.matmul %150, %1, %cst_89 {dimension_numbers = #tpu.dot_dimension_numbers<[1], [0], [0], [1], [0, 0, 1, 1], [], []>} : vector<16x128xbf16>, vector<128x128xbf16>, vector<16x128xf32> -> vector<16x128xf32>
    %cst_90 = arith.constant 5.000000e-01 : f32
    %152 = vector.broadcast %cst_90 : f32 to vector<16x128xf32>
    %153 = arith.mulf %151, %152 : vector<16x128xf32>
    %c0_91 = arith.constant 0 : index
    %c512 = arith.constant 512 : index
    %154 = vector.load %arg2[%c0_91, %c512] : memref<16x640xbf16, #tpu.memory_space<vmem>>, vector<16x128xbf16>
    %c4 = arith.constant 4 : index
    %c0_92 = arith.constant 0 : index
    %c0_93 = arith.constant 0 : index
    %155 = vector.load %arg3[%c4, %c0_92, %c0_93] : memref<5x128x128xbf16, #tpu.memory_space<vmem>>, vector<1x128x128xbf16>
    %156 = vector.shape_cast %155 : vector<1x128x128xbf16> to vector<128x128xbf16>
    %cst_94 = arith.constant dense<0.000000e+00> : vector<16x128xf32>
    %157 = tpu.matmul %154, %156, %cst_94 {dimension_numbers = #tpu.dot_dimension_numbers<[1], [0], [0], [1], [0, 0, 1, 1], [], []>} : vector<16x128xbf16>, vector<128x128xbf16>, vector<16x128xf32> -> vector<16x128xf32>
    %c4_95 = arith.constant 4 : index
    %c0_96 = arith.constant 0 : index
    %c0_97 = arith.constant 0 : index
    %158 = vector.load %arg4[%c4_95, %c0_96, %c0_97] : memref<5x1x128xf32, #tpu.memory_space<vmem>>, vector<1x1x128xf32>
    %159 = vector.shape_cast %158 : vector<1x1x128xf32> to vector<1x128xf32>
    %160 = vector.broadcast %159 : vector<1x128xf32> to vector<16x128xf32>
    %161 = arith.addf %157, %160 : vector<16x128xf32>
    %cst_98 = arith.constant 5.000000e-01 : f32
    %162 = vector.broadcast %cst_98 : f32 to vector<16x128xf32>
    %163 = arith.mulf %162, %161 : vector<16x128xf32>
    %cst_99 = arith.constant 4.471500e-02 : f32
    %164 = vector.broadcast %cst_99 : f32 to vector<16x128xf32>
    %165 = arith.mulf %164, %161 : vector<16x128xf32>
    %166 = arith.mulf %165, %161 : vector<16x128xf32>
    %167 = arith.mulf %166, %161 : vector<16x128xf32>
    %168 = arith.addf %161, %167 : vector<16x128xf32>
    %cst_100 = arith.constant 0.797884583 : f32
    %169 = vector.broadcast %cst_100 : f32 to vector<16x128xf32>
    %170 = arith.mulf %169, %168 : vector<16x128xf32>
    %171 = math.tanh %170 : vector<16x128xf32>
    %cst_101 = arith.constant 1.000000e+00 : f32
    %172 = vector.broadcast %cst_101 : f32 to vector<16x128xf32>
    %173 = arith.addf %172, %171 : vector<16x128xf32>
    %174 = arith.mulf %163, %173 : vector<16x128xf32>
    %175 = arith.truncf %174 : vector<16x128xf32> to vector<16x128xbf16>
    %c4_102 = arith.constant 4 : index
    %c0_103 = arith.constant 0 : index
    %c0_104 = arith.constant 0 : index
    %176 = vector.load %arg5[%c4_102, %c0_103, %c0_104] : memref<5x128x256xbf16, #tpu.memory_space<vmem>>, vector<1x128x256xbf16>
    %177 = vector.shape_cast %176 : vector<1x128x256xbf16> to vector<128x256xbf16>
    %cst_105 = arith.constant dense<0.000000e+00> : vector<16x256xf32>
    %178 = tpu.matmul %175, %177, %cst_105 {dimension_numbers = #tpu.dot_dimension_numbers<[1], [0], [0], [1], [0, 0, 1, 1], [], []>} : vector<16x128xbf16>, vector<128x256xbf16>, vector<16x256xf32> -> vector<16x256xf32>
    %c4_106 = arith.constant 4 : index
    %c0_107 = arith.constant 0 : index
    %c0_108 = arith.constant 0 : index
    %179 = vector.load %arg6[%c4_106, %c0_107, %c0_108] : memref<5x1x256xf32, #tpu.memory_space<vmem>>, vector<1x1x256xf32>
    %180 = vector.shape_cast %179 : vector<1x1x256xf32> to vector<1x256xf32>
    %181 = vector.broadcast %180 : vector<1x256xf32> to vector<16x256xf32>
    %182 = arith.addf %178, %181 : vector<16x256xf32>
    %183 = vector.extract_strided_slice %182 {offsets = [0, 0], sizes = [16, 128], strides = [1, 1]} : vector<16x256xf32> to vector<16x128xf32>
    %184 = vector.extract_strided_slice %182 {offsets = [0, 128], sizes = [16, 128], strides = [1, 1]} : vector<16x256xf32> to vector<16x128xf32>
    %185 = arith.mulf %8, %183 : vector<16x128xf32>
    %186 = arith.truncf %185 : vector<16x128xf32> to vector<16x128xbf16>
    %cst_109 = arith.constant dense<0.000000e+00> : vector<16x128xf32>
    %187 = tpu.matmul %186, %1, %cst_109 {dimension_numbers = #tpu.dot_dimension_numbers<[1], [0], [0], [1], [0, 0, 1, 1], [], []>} : vector<16x128xbf16>, vector<128x128xbf16>, vector<16x128xf32> -> vector<16x128xf32>
    %cst_110 = arith.constant 5.000000e-01 : f32
    %188 = vector.broadcast %cst_110 : f32 to vector<16x128xf32>
    %189 = arith.mulf %187, %188 : vector<16x128xf32>
    %190 = arith.maximumf %45, %81 : vector<16x128xf32>
    %191 = arith.maximumf %190, %117 : vector<16x128xf32>
    %192 = arith.maximumf %191, %153 : vector<16x128xf32>
    %193 = arith.maximumf %192, %189 : vector<16x128xf32>
    %194 = arith.subf %45, %193 : vector<16x128xf32>
    %195 = math.exp %194 : vector<16x128xf32>
    %196 = arith.subf %81, %193 : vector<16x128xf32>
    %197 = math.exp %196 : vector<16x128xf32>
    %198 = arith.subf %117, %193 : vector<16x128xf32>
    %199 = math.exp %198 : vector<16x128xf32>
    %200 = arith.subf %153, %193 : vector<16x128xf32>
    %201 = math.exp %200 : vector<16x128xf32>
    %202 = arith.subf %189, %193 : vector<16x128xf32>
    %203 = math.exp %202 : vector<16x128xf32>
    %204 = arith.mulf %195, %40 : vector<16x128xf32>
    %205 = arith.addf %195, %197 : vector<16x128xf32>
    %206 = arith.mulf %197, %76 : vector<16x128xf32>
    %207 = arith.addf %204, %206 : vector<16x128xf32>
    %208 = arith.addf %205, %199 : vector<16x128xf32>
    %209 = arith.mulf %199, %112 : vector<16x128xf32>
    %210 = arith.addf %207, %209 : vector<16x128xf32>
    %211 = arith.addf %208, %201 : vector<16x128xf32>
    %212 = arith.mulf %201, %148 : vector<16x128xf32>
    %213 = arith.addf %210, %212 : vector<16x128xf32>
    %214 = arith.addf %211, %203 : vector<16x128xf32>
    %215 = arith.mulf %203, %184 : vector<16x128xf32>
    %216 = arith.addf %213, %215 : vector<16x128xf32>
    %217 = arith.divf %216, %214 : vector<16x128xf32>
    %218 = arith.truncf %217 : vector<16x128xf32> to vector<16x128xbf16>
    %c0_111 = arith.constant 0 : index
    %c0_112 = arith.constant 0 : index
    %219 = vector.load %arg9[%c0_111, %c0_112] : memref<128x128xbf16, #tpu.memory_space<vmem>>, vector<128x128xbf16>
    %cst_113 = arith.constant dense<0.000000e+00> : vector<16x128xf32>
    %220 = tpu.matmul %218, %219, %cst_113 {dimension_numbers = #tpu.dot_dimension_numbers<[1], [0], [0], [1], [0, 0, 1, 1], [], []>} : vector<16x128xbf16>, vector<128x128xbf16>, vector<16x128xf32> -> vector<16x128xf32>
    %221 = arith.addf %9, %220 : vector<16x128xf32>
    %cst_114 = arith.constant dense<0.000000e+00> : vector<16x128xf32>
    %222 = tpu.matmul %221, %2, %cst_114 {dimension_numbers = #tpu.dot_dimension_numbers<[1], [0], [0], [1], [0, 0, 1, 1], [], []>} : vector<16x128xf32>, vector<128x128xf32>, vector<16x128xf32> -> vector<16x128xf32>
    %223 = arith.mulf %221, %221 : vector<16x128xf32>
    %cst_115 = arith.constant dense<0.000000e+00> : vector<16x128xf32>
    %224 = tpu.matmul %223, %2, %cst_115 {dimension_numbers = #tpu.dot_dimension_numbers<[1], [0], [0], [1], [0, 0, 1, 1], [], []>} : vector<16x128xf32>, vector<128x128xf32>, vector<16x128xf32> -> vector<16x128xf32>
    %225 = arith.mulf %222, %222 : vector<16x128xf32>
    %226 = arith.subf %224, %225 : vector<16x128xf32>
    %227 = arith.subf %221, %222 : vector<16x128xf32>
    %cst_116 = arith.constant 9.99999974E-6 : f32
    %228 = vector.broadcast %cst_116 : f32 to vector<16x128xf32>
    %229 = arith.addf %226, %228 : vector<16x128xf32>
    %230 = math.rsqrt %229 : vector<16x128xf32>
    %231 = arith.mulf %227, %230 : vector<16x128xf32>
    %c0_117 = arith.constant 0 : index
    %c0_118 = arith.constant 0 : index
    %232 = vector.load %arg10[%c0_117, %c0_118] : memref<1x128xf32, #tpu.memory_space<vmem>>, vector<1x128xf32>
    %233 = vector.broadcast %232 : vector<1x128xf32> to vector<16x128xf32>
    %234 = arith.mulf %231, %233 : vector<16x128xf32>
    %c0_119 = arith.constant 0 : index
    %c0_120 = arith.constant 0 : index
    %235 = vector.load %arg11[%c0_119, %c0_120] : memref<1x128xf32, #tpu.memory_space<vmem>>, vector<1x128xf32>
    %236 = vector.broadcast %235 : vector<1x128xf32> to vector<16x128xf32>
    %237 = arith.addf %234, %236 : vector<16x128xf32>
    %cst_121 = arith.constant 5.000000e-01 : f32
    %238 = vector.broadcast %cst_121 : f32 to vector<16x128xf32>
    %239 = arith.mulf %238, %237 : vector<16x128xf32>
    %cst_122 = arith.constant 4.471500e-02 : f32
    %240 = vector.broadcast %cst_122 : f32 to vector<16x128xf32>
    %241 = arith.mulf %240, %237 : vector<16x128xf32>
    %242 = arith.mulf %241, %237 : vector<16x128xf32>
    %243 = arith.mulf %242, %237 : vector<16x128xf32>
    %244 = arith.addf %237, %243 : vector<16x128xf32>
    %cst_123 = arith.constant 0.797884583 : f32
    %245 = vector.broadcast %cst_123 : f32 to vector<16x128xf32>
    %246 = arith.mulf %245, %244 : vector<16x128xf32>
    %247 = math.tanh %246 : vector<16x128xf32>
    %cst_124 = arith.constant 1.000000e+00 : f32
    %248 = vector.broadcast %cst_124 : f32 to vector<16x128xf32>
    %249 = arith.addf %248, %247 : vector<16x128xf32>
    %250 = arith.mulf %239, %249 : vector<16x128xf32>
    %c0_125 = arith.constant 0 : index
    %c0_126 = arith.constant 0 : index
    %251 = vector.load %arg14[%c0_125, %c0_126] : memref<16x128xf32, #tpu.memory_space<vmem>>, vector<16x128xf32>
    tpu.vector_store %arg14[%c0_125, %c0_126], %250 {strides = array<i32>} : memref<16x128xf32, #tpu.memory_space<vmem>>, vector<16x128xf32>,
    return
  }
  func.func @transform_0(%arg0: i32) -> (i32, i32) {
    %c0_i32 = arith.constant 0 : i32
    %c0_i32_0 = arith.constant 0 : i32
    return %arg0, %c0_i32 : i32, i32
  }
  func.func @transform_1(%arg0: i32) -> (i32, i32) {
    %c0_i32 = arith.constant 0 : i32
    %c0_i32_0 = arith.constant 0 : i32
    return %arg0, %c0_i32 : i32, i32
  }
  func.func @transform_2(%arg0: i32) -> (i32, i32, i32) {
    %c0_i32 = arith.constant 0 : i32
    %c0_i32_0 = arith.constant 0 : i32
    %c0_i32_1 = arith.constant 0 : i32
    %c0_i32_2 = arith.constant 0 : i32
    return %c0_i32, %c0_i32_0, %c0_i32_1 : i32, i32, i32
  }
  func.func @transform_3(%arg0: i32) -> (i32, i32, i32) {
    %c0_i32 = arith.constant 0 : i32
    %c0_i32_0 = arith.constant 0 : i32
    %c0_i32_1 = arith.constant 0 : i32
    %c0_i32_2 = arith.constant 0 : i32
    return %c0_i32, %c0_i32_0, %c0_i32_1 : i32, i32, i32
  }
  func.func @transform_4(%arg0: i32) -> (i32, i32, i32) {
    %c0_i32 = arith.constant 0 : i32
    %c0_i32_0 = arith.constant 0 : i32
    %c0_i32_1 = arith.constant 0 : i32
    %c0_i32_2 = arith.constant 0 : i32
    return %c0_i32, %c0_i32_0, %c0_i32_1 : i32, i32, i32
  }
  func.func @transform_5(%arg0: i32) -> (i32, i32, i32) {
    %c0_i32 = arith.constant 0 : i32
    %c0_i32_0 = arith.constant 0 : i32
    %c0_i32_1 = arith.constant 0 : i32
    %c0_i32_2 = arith.constant 0 : i32
    return %c0_i32, %c0_i32_0, %c0_i32_1 : i32, i32, i32
  }
  func.func @transform_6(%arg0: i32) -> (i32, i32) {
    %c0_i32 = arith.constant 0 : i32
    %c0_i32_0 = arith.constant 0 : i32
    %c0_i32_1 = arith.constant 0 : i32
    return %c0_i32, %c0_i32_0 : i32, i32
  }
  func.func @transform_7(%arg0: i32) -> (i32, i32) {
    %c0_i32 = arith.constant 0 : i32
    %c0_i32_0 = arith.constant 0 : i32
    %c0_i32_1 = arith.constant 0 : i32
    return %c0_i32, %c0_i32_0 : i32, i32
  }
  func.func @transform_8(%arg0: i32) -> (i32, i32) {
    %c0_i32 = arith.constant 0 : i32
    %c0_i32_0 = arith.constant 0 : i32
    %c0_i32_1 = arith.constant 0 : i32
    return %c0_i32, %c0_i32_0 : i32, i32
  }
  func.func @transform_9(%arg0: i32) -> (i32, i32) {
    %c0_i32 = arith.constant 0 : i32
    %c0_i32_0 = arith.constant 0 : i32
    %c0_i32_1 = arith.constant 0 : i32
    return %c0_i32, %c0_i32_0 : i32, i32
  }
  func.func @transform_10(%arg0: i32) -> (i32, i32) {
    %c0_i32 = arith.constant 0 : i32
    %c0_i32_0 = arith.constant 0 : i32
    %c0_i32_1 = arith.constant 0 : i32
    return %c0_i32, %c0_i32_0 : i32, i32
  }
  func.func @transform_11(%arg0: i32) -> (i32, i32) {
    %c0_i32 = arith.constant 0 : i32
    %c0_i32_0 = arith.constant 0 : i32
    %c0_i32_1 = arith.constant 0 : i32
    return %c0_i32, %c0_i32_0 : i32, i32
  }
  func.func @transform_12(%arg0: i32) -> (i32, i32) {
    %c0_i32 = arith.constant 0 : i32
    %c0_i32_0 = arith.constant 0 : i32
    %c0_i32_1 = arith.constant 0 : i32
    return %c0_i32, %c0_i32_0 : i32, i32
  }
  func.func @transform_13(%arg0: i32) -> (i32, i32) {
    %c0_i32 = arith.constant 0 : i32
    %c0_i32_0 = arith.constant 0 : i32
    return %arg0, %c0_i32 : i32, i32
  }
}

</mosaic_0001>

<bundles_post_ra>
// kernel: tpu_custom_call.1
= control target key start
LH: loop header
LB: loop body
LE: loop exit
PB: predicated region body
PF: predicated region fallthrough
CT: control target
= control target key end

     0   :  { %s5353_s0 = inlined_call_operand.hbm [shape: bf16[32,128], index: 0, kind: input, shape index: {}]   ;;  %s5354_s1 = inlined_call_operand.hbm [shape: bf16[32,640], index: 1, kind: input, shape index: {}]   ;;  %s5355_s2 = inlined_call_operand.hbm [shape: bf16[5,128,128], index: 2, kind: input, shape index: {}]   ;;  %s5356_s3 = inlined_call_operand.vmem [shape: f32[5,1,128], index: 3, kind: input, shape index: {}]   ;;  %s5357_s4 = inlined_call_operand.hbm [shape: bf16[5,128,256], index: 4, kind: input, shape index: {}]   ;;  %s5358_s5 = inlined_call_operand.vmem [shape: f32[5,1,256], index: 5, kind: input, shape index: {}]   ;;  %s5359_s6 = inlined_call_operand.hbm [shape: bf16[128,256], index: 6, kind: input, shape index: {}]   ;;  %s5360_s7 = inlined_call_operand.vmem [shape: f32[1,256], index: 7, kind: input, shape index: {}]   ;;  %s5361_s8 = inlined_call_operand.hbm [shape: bf16[128,128], index: 8, kind: input, shape index: {}]   ;;  %s5362_s9 = inlined_call_operand.vmem [shape: f32[1,128], index: 9, kind: input, shape index: {}]   ;;  %s5363_s10 = inlined_call_operand.vmem [shape: f32[1,128], index: 10, kind: input, shape index: {}]   ;;  %s5364_s11 = inlined_call_operand.hbm [shape: bf16[128,128], index: 11, kind: input, shape index: {}]   ;;  %s5365_s12 = inlined_call_operand.hbm [shape: f32[128,128], index: 12, kind: input, shape index: {}]   ;;  %s5366_s13 = inlined_call_operand.hbm [shape: f32[32,128], index: 13, kind: output, shape index: {}]  }
   0x1   :  { %5379 = sst [smem:[#allocation24_spill]] %s5353_s0 }
   0x2   :  { %5380 = sst [smem:[#allocation25_spill]] %s5355_s2 }
   0x3   :  { %5381 = sst [smem:[#allocation26_spill]] %s5357_s4 }
   0x4   :  { %5382 = sst [smem:[#allocation27_spill]] %s5358_s5 }
   0x5   :  { %5383 = sst [smem:[#allocation28_spill]] %s5359_s6 }
   0x6   :  { %5384 = sst [smem:[#allocation29_spill]] %s5360_s7 }
   0x7   :  { %5385 = sst [smem:[#allocation30_spill]] %s5361_s8 }
   0x8   :  { %5386 = sst [smem:[#allocation31_spill]] %s5362_s9 }
   0x9   :  { %5387 = sst [smem:[#allocation32_spill]] %s5363_s10 }
   0xa   :  { %5388 = sst [smem:[#allocation33_spill]] %s5364_s11 }
   0xb   :  { %5389 = sst [smem:[#allocation34_spill]] %s5366_s13 }
   0xc   :  { %18 = vsyncpa [#allocation3], 0 }
   0xd   :  { %20 = vsyncpa [#allocation3 + $0x1], 0 }
   0xe   :  { %21 = vsyncpa [#allocation6], 0 }
   0xf   :  { %23 = vsyncpa [#allocation6 + $0x1], 0 }
  0x10   :  { %24 = vsyncpa [#allocation9], 0 }
  0x11   :  { %25 = vsyncpa [#allocation12], 0 }
  0x12   :  { %26 = vsyncpa [#allocation15], 0 }
  0x13   :  { %27 = vsyncpa [#allocation4], 0 }
  0x14   :  { %29 = vsyncpa [#allocation4 + $0x1], 0  ;;  %s4555_s25 = smov 0   ;;  %s4557_s26 = smov 0  }
  0x15   :  { %s4559_s27 = smov 0   ;;  %s4561_s28 = smov 0  }
  0x16 LB: > { %s4465_s29 = smov [#allocation7]   ;;  %s4576_s14 = sadd.s32 4294967295, %s4463_s28   ;;  %s4463_s28 = sphi %s4561_s28, %s5430_s28   ;;  %s4459_s27 = sphi %s4559_s27, %s5429_s27   ;;  %s4455_s26 = sphi %s4557_s26, %s5428_s26   ;;  %s4451_s25 = sphi %s4555_s25, %s5427_s25  }
  0x17   : > { %s361_s30 = sshll.u32 %s4465_s29, 4  ;;  %p3072_p0 = scmp.ge.s32.totalorder %s4463_s28, 1  ;;  %s4581_s30 = int_to_ptr.vmem [resolvable:$true] %s361_s30 }
  0x18   : > { %p5371_p1 = scmp.eq.s32.totalorder %s4576_s14, 0  ;;  %p349_p2 = scmp.lt.s32.totalorder %s4463_s28, 3 }
  0x19   : > { %s4466_s16 = smov [#allocation8]   ;;  %s4467_s19 = smov [#allocation11]  }
  0x1a   : > { %p4583_p3 = pnand %p3072_p0, %p349_p2  ;;  %s377_s17 = sshll.u32 %s4466_s16, 4  ;;  %s4596_s17 = int_to_ptr.vmem [resolvable:$true] %s377_s17 }
  0x1b   : > { %s4598_s20 = sshll.u32 %s4467_s19, 4  ;;  %s5392_s2 = sld [smem:[#allocation25_spill]]  ;;  %s410_s20 = int_to_ptr.vmem [resolvable:$true] %s4598_s20 }
  0x1c   : > { %s5390_s15 = scalar_select %p4583_p3, 1, 0 }
  0x1d   : > { %p3797_p5 = pneg %p4583_p3 }
  0x1f   : > { %p4592_p6 = pnand %p3797_p5, %p5371_p1 }
  0x21   : > { %s4149_s23 = scalar_lea.hbm %s5392_s2, 5120  ;;  %p4608_p8 = pneg %p4592_p6 }
  0x22   : > { %p4150_p7 = scmp.ne.s32.totalorder %s5392_s2, %s4149_s23  ;;  %p4156_p11 = scmp.lt.u32.totalorder %s4149_s23, %s5392_s2 }
  0x24   : > { %p4152_p9 = pnand %p4608_p8, %p4150_p7 }
  0x26   : > { %p4153_p10 = pneg %p4152_p9 }
  0x28   : > { %p4158_p12 = pnand %p4156_p11, %p4153_p10 }
  0x2a   : > { %4161 = shalt.err (!%p4158_p12)
}
  0x2b   : > { %s4162_s21 = scalar_lea.vmem %s4581_s30, 5120  ;;  %p4170_p5 = scmp.lt.s32.totalorder %s4581_s30, %s4581_s30 }
  0x2c   : > { %p4163_p13 = scmp.ne.s32.totalorder %s4581_s30, %s4162_s21  ;;  %p4171_p4 = scmp.lt.s32.totalorder %s4162_s21, %s4162_s21 }
  0x2e   : > { %p4165_p0 = pnand %p4163_p13, %p4608_p8  ;;  %p4172_p7 = por %p4171_p4, %p4170_p5 }
  0x30   : > { %p4166_p2 = pneg %p4165_p0 }
  0x32   : > { %p4173_p9 = pnand %p4172_p7, %p4166_p2 }
  0x34   : > { %4176 = shalt.err (!%p4173_p9)
}
  0x35   : > { %s5369_s22 = smov 64   ;;  %s5377_s13 = smov 4  }
  0x36   : > { %3800 = dma.hbm_to_vmem [thread:$0]  (!%p4592_p6), %s5392_s2, 5120, %s4581_s30, [#allocation6], %s5369_s22, %s5369_s22, %s5377_s13  }
  0x37   : > { %s5394_s4 = sld [smem:[#allocation26_spill]] }
  0x3d   : > { %s4177_s21 = scalar_lea.hbm %s5394_s4, 10240 }
  0x3e   : > { %p4178_p4 = scmp.ne.s32.totalorder %s5394_s4, %s4177_s21  ;;  %p4184_p12 = scmp.lt.u32.totalorder %s4177_s21, %s5394_s4 }
  0x40   : > { %p4180_p10 = pnand %p4178_p4, %p4608_p8 }
  0x42   : > { %p4181_p11 = pneg %p4180_p10 }
  0x44   : > { %p4186_p13 = pnand %p4184_p12, %p4181_p11 }
  0x46   : > { %4189 = shalt.err (!%p4186_p13)
}
  0x47   : > { %s4190_s30 = scalar_lea.vmem %s4596_s17, 10240  ;;  %p4198_p7 = scmp.lt.s32.totalorder %s4596_s17, %s4596_s17 }
  0x48   : > { %p4191_p0 = scmp.ne.s32.totalorder %s4596_s17, %s4190_s30  ;;  %p4199_p9 = scmp.lt.s32.totalorder %s4190_s30, %s4190_s30 }
  0x4a   : > { %p4193_p2 = pnand %p4191_p0, %p4608_p8  ;;  %p4200_p4 = por %p4199_p9, %p4198_p7 }
  0x4c   : > { %p4194_p5 = pneg %p4193_p2 }
  0x4e   : > { %p4201_p10 = pnand %p4200_p4, %p4194_p5 }
  0x50   : > { %4204 = shalt.err (!%p4201_p10)
}
  0x51   : > { %s5373_s9 = smov 128   ;;  %s5375_s5 = smov 8  }
  0x52   : > { %3803 = dma.hbm_to_vmem [thread:$0]  (!%p4592_p6), %s5394_s4, 10240, %s4596_s17, [#allocation9], %s5373_s9, %s5373_s9, %s5375_s5  }
  0x53   : > { %s5395_s8 = sld [smem:[#allocation30_spill]] }
  0x59   : > { %s4205_s29 = scalar_lea.hbm %s5395_s8, 1024 }
  0x5a   : > { %p4206_p11 = scmp.ne.s32.totalorder %s5395_s8, %s4205_s29  ;;  %p4212_p0 = scmp.lt.u32.totalorder %s4205_s29, %s5395_s8 }
  0x5c   : > { %p4208_p12 = pnand %p4206_p11, %p4608_p8 }
  0x5e   : > { %p4209_p13 = pneg %p4208_p12 }
  0x60   : > { %p4214_p2 = pnand %p4212_p0, %p4209_p13 }
  0x62   : > { %4217 = shalt.err (!%p4214_p2)
}
  0x63   : > { %s4218_s7 = scalar_lea.vmem %s410_s20, 1024  ;;  %p4226_p4 = scmp.lt.s32.totalorder %s410_s20, %s410_s20 }
  0x64   : > { %p4219_p5 = scmp.ne.s32.totalorder %s410_s20, %s4218_s7  ;;  %p4227_p10 = scmp.lt.s32.totalorder %s4218_s7, %s4218_s7 }
  0x66   : > { %p4221_p7 = pnand %p4219_p5, %p4608_p8  ;;  %p4228_p1 = por %p4227_p10, %p4226_p4 }
  0x68   : > { %p4222_p9 = pneg %p4221_p7 }
  0x6a   : > { %p4229_p3 = pnand %p4228_p1, %p4222_p9 }
  0x6c   : > { %4232 = shalt.err (!%p4229_p3)
}
  0x6d   : > { %s5396_s17 = smov 64   ;;  %s4472_s23 = smov [#allocation10]  }
  0x6e   : > { %3809 = dma.hbm_to_vmem [thread:$0]  (!%p4592_p6), %s5395_s8, 1024, %s410_s20, [#allocation12], %s5396_s17, %s5396_s17, %s5377_s13  }
  0x6f   : > { %s393_s24 = sshll.u32 %s4472_s23, 4  ;;  %s4473_s29 = smov [#allocation13]   ;;  %s394_s24 = int_to_ptr.vmem [resolvable:$true] %s393_s24 }
  0x70   : > { %s428_s19 = sshll.u32 %s4473_s29, 4  ;;  %s5397_s6 = sld [smem:[#allocation28_spill]]  ;;  %s429_s19 = int_to_ptr.vmem [resolvable:$true] %s428_s19 }
  0x76   : > { %s4233_s7 = scalar_lea.hbm %s5397_s6, 2048 }
  0x77   : > { %p4234_p1 = scmp.ne.s32.totalorder %s5397_s6, %s4233_s7  ;;  %p4240_p12 = scmp.lt.u32.totalorder %s4233_s7, %s5397_s6 }
  0x79   : > { %p4236_p3 = pnand %p4234_p1, %p4608_p8 }
  0x7b   : > { %p4237_p11 = pneg %p4236_p3 }
  0x7d   : > { %p4242_p13 = pnand %p4240_p12, %p4237_p11 }
  0x7f   : > { %4245 = shalt.err (!%p4242_p13)
}
  0x80   : > { %s4246_s20 = scalar_lea.vmem %s394_s24, 2048  ;;  %p4254_p7 = scmp.lt.s32.totalorder %s394_s24, %s394_s24 }
  0x81   : > { %p4247_p0 = scmp.ne.s32.totalorder %s394_s24, %s4246_s20  ;;  %p4255_p9 = scmp.lt.s32.totalorder %s4246_s20, %s4246_s20 }
  0x83   : > { %p4249_p2 = pnand %p4247_p0, %p4608_p8  ;;  %p4256_p4 = por %p4255_p9, %p4254_p7 }
  0x85   : > { %p4250_p5 = pneg %p4249_p2 }
  0x87   : > { %p4257_p10 = pnand %p4256_p4, %p4250_p5 }
  0x89   : > { %4260 = shalt.err (!%p4257_p10)
}
  0x8a   : > { %s5398_s9 = smov 8   ;;  %s5399_s5 = smov 128  }
  0x8b   : > { %3806 = dma.hbm_to_vmem [thread:$0]  (!%p4592_p6), %s5397_s6, 2048, %s394_s24, [#allocation9], %s5399_s5, %s5399_s5, %s5398_s9  }
  0x8c   : > { %s5400_s11 = sld [smem:[#allocation33_spill]] }
  0x92   : > { %s4261_s21 = scalar_lea.hbm %s5400_s11, 1024 }
  0x93   : > { %p4262_p1 = scmp.ne.s32.totalorder %s5400_s11, %s4261_s21  ;;  %p4268_p12 = scmp.lt.u32.totalorder %s4261_s21, %s5400_s11 }
  0x95   : > { %p4264_p3 = pnand %p4262_p1, %p4608_p8 }
  0x97   : > { %p4265_p11 = pneg %p4264_p3 }
  0x99   : > { %p4270_p13 = pnand %p4268_p12, %p4265_p11 }
  0x9b   : > { %4273 = shalt.err (!%p4270_p13)
}
  0x9c   : > { %s4274_s2 = scalar_lea.vmem %s429_s19, 1024  ;;  %p4282_p7 = scmp.lt.s32.totalorder %s429_s19, %s429_s19 }
  0x9d   : > { %p4275_p0 = scmp.ne.s32.totalorder %s429_s19, %s4274_s2  ;;  %p4283_p9 = scmp.lt.s32.totalorder %s4274_s2, %s4274_s2 }
  0x9f   : > { %p4277_p2 = pnand %p4275_p0, %p4608_p8  ;;  %p4284_p4 = por %p4283_p9, %p4282_p7 }
  0xa1   : > { %p4278_p5 = pneg %p4277_p2 }
  0xa3   : > { %p4285_p10 = pnand %p4284_p4, %p4278_p5 }
  0xa5   : > { %4288 = shalt.err (!%p4285_p10)
}
  0xa6   : > { %3812 = dma.hbm_to_vmem [thread:$0]  (!%p4592_p6), %s5400_s11, 1024, %s429_s19, [#allocation12], %s5396_s17, %s5396_s17, %s5377_s13  }
  0xa7   : > { %s4474_s23 = smov [#allocation14]   ;;  %s4289_s7 = scalar_lea.hbm %s5365_s12, 2048 }
  0xa8   : > { %s441_s29 = sshll.u32 %s4474_s23, 4  ;;  %p4290_p1 = scmp.ne.s32.totalorder %s5365_s12, %s4289_s7  ;;  %s442_s29 = int_to_ptr.vmem [resolvable:$true] %s441_s29 }
  0xa9   : > { %p4296_p12 = scmp.lt.u32.totalorder %s4289_s7, %s5365_s12 }
  0xaa   : > { %p4292_p3 = pnand %p4290_p1, %p4608_p8 }
  0xac   : > { %p4293_p11 = pneg %p4292_p3 }
  0xae   : > { %p4298_p13 = pnand %p4296_p12, %p4293_p11 }
  0xb0   : > { %4301 = shalt.err (!%p4298_p13)
}
  0xb1   : > { %s4302_s19 = scalar_lea.vmem %s442_s29, 2048  ;;  %p4310_p7 = scmp.lt.s32.totalorder %s442_s29, %s442_s29 }
  0xb2   : > { %p4303_p0 = scmp.ne.s32.totalorder %s442_s29, %s4302_s19  ;;  %p4311_p9 = scmp.lt.s32.totalorder %s4302_s19, %s4302_s19 }
  0xb4   : > { %p4305_p2 = pnand %p4303_p0, %p4608_p8  ;;  %p4312_p4 = por %p4311_p9, %p4310_p7 }
  0xb6   : > { %p4306_p5 = pneg %p4305_p2 }
  0xb8   : > { %p4313_p10 = pnand %p4312_p4, %p4306_p5 }
  0xba   : > { %4316 = shalt.err (!%p4313_p10)
}
  0xbb   : > { %3815 = dma.hbm_to_vmem [thread:$0]  (!%p4592_p6), %s5365_s12, 2048, %s442_s29, [#allocation15], %s5399_s5, %s5399_s5, %s5398_s9  }
  0xbc   : > { %s3071_s18 = sadd.s32 4294967294, %s4463_s28   ;;  %s4745_s16 = sadd.s32 1, %s4463_s28  }
  0xbd   : > { %s39_s10 = ssub.s32 %s4463_s28, %s4745_s16  ;;  %s42_s23 = sadd.s32 1, %s4459_s27 }
  0xbe   : > { %p40_p8 = scmp.eq.s32.totalorder %s39_s10, 0  ;;  %p49_p1 = scmp.ne.s32.totalorder %s4459_s27, %s4455_s26 }
  0xbf   : > { %p50_p3 = scmp.eq.s32.totalorder %s4463_s28, 0  ;;  %p55_p11 = scmp.ne.s32.totalorder %s4455_s26, %s4451_s25 }
  0xc0   : > { %s4756_s21 = scalar_select %p40_p8, %s4459_s27, %s42_s23  }
  0xc1   : > { %p4758_p12 = por %p50_p3, %p49_p1  ;;  %p5402_p13 = scmp.eq.s32.totalorder %s4576_s14, 0 }
  0xc2   : > { %p336_p0 = scmp.eq.s32.totalorder %s4576_s14, 1  ;;  %p342_p2 = scmp.eq.s32.totalorder %s3071_s18, 1 }
  0xc3   : > { %p4764_p6 = por %p5402_p13, %p55_p11  ;;  %p3833_p5 = scmp.lt.s32.totalorder %s4463_s28, 2 }
  0xc4   : > { %s4771_s5 = sand.u32 1, %s4459_s27   ;;  %p4773_p7 = por %p336_p0, %p49_p1 }
  0xc5   : > { %p4777_p9 = por %p342_p2, %p55_p11  ;;  %s3080_s22 = sshll.u32 %s4771_s5, 3 }
  0xc6   : > { %s5404_s29 = scalar_select %p4773_p7, 1, 0 }
  0xc7   : > { %s5405_s7 = scalar_select %p4777_p9, 1, 0 }
  0xc8   : > { %s3273_s20 = sshll.u32 %s4463_s28, 7  ;;  %s5406_s0 = sld [smem:[#allocation24_spill]] }
  0xc9   : > { %s459_s24 = scalar_lea.vmem [#allocation2], %s3080_s22  ;;  %p4792_p4 = pnand %p3833_p5, %p4758_p12 }
  0xca   : > { %s466_s18 = sshll.u32 %s459_s24, 4  ;;  %s3764_s13 = smul.u32 40, %s4771_s5  ;;  %s4788_s18 = int_to_ptr.vmem [resolvable:$true] %s466_s18 }
  0xcb   : > { %s456_s2 = scalar_lea.sflag [#allocation3], %s4771_s5  ;;  %p4319_p8 = pneg %p4792_p4 }
  0xce   : > { %s4786_s4 = scalar_lea.hbm %s5406_s0, %s3273_s20  ;;  %s4322_s30 = scalar_lea.hbm %s5406_s0, 256 }
  0xcf   : > { %s4317_s20 = scalar_lea.hbm %s4786_s4, 128  ;;  %p4323_p11 = scmp.lt.u32.totalorder %s4786_s4, %s5406_s0 }
  0xd0   : > { %p4318_p10 = scmp.ne.s32.totalorder %s4786_s4, %s4317_s20  ;;  %p4324_p12 = scmp.lt.u32.totalorder %s4322_s30, %s4317_s20 }
  0xd1   : > { %p4326_p0 = scmp.lt.u32.totalorder %s4317_s20, %s4786_s4 }
  0xd2   : > { %p4320_p1 = pnand %p4319_p8, %p4318_p10  ;;  %p4325_p13 = por %p4324_p12, %p4323_p11 }
  0xd4   : > { %p4321_p3 = pneg %p4320_p1  ;;  %p4327_p2 = por %p4326_p0, %p4325_p13 }
  0xd6   : > { %p4328_p5 = pnand %p4327_p2, %p4321_p3 }
  0xd8   : > { %4331 = shalt.err (!%p4328_p5)
}
  0xd9   : > { %s4332_s23 = scalar_lea.vmem %s4788_s18, 128  ;;  %s4475_s22 = smov [#allocation2]  }
  0xda   : > { %p4333_p10 = scmp.ne.s32.totalorder %s4788_s18, %s4332_s23  ;;  %s4337_s19 = sshll.u32 %s4475_s22, 4  ;;  %s4338_s19 = int_to_ptr.vmem [resolvable:$false] %s4337_s19 }
  0xdb   : > { %s4339_s6 = scalar_lea.vmem %s4338_s19, 256  ;;  %p4340_p7 = scmp.lt.s32.totalorder %s4788_s18, %s4338_s19 }
  0xdc   : > { %p4335_p1 = pnand %p4333_p10, %p4319_p8  ;;  %p4341_p11 = scmp.lt.s32.totalorder %s4339_s6, %s4332_s23 }
  0xde   : > { %p4336_p9 = pneg %p4335_p1  ;;  %p4342_p12 = por %p4341_p11, %p4340_p7 }
  0xe0   : > { %p4343_p13 = pnand %p4342_p12, %p4336_p9 }
  0xe2   : > { %4346 = shalt.err (!%p4343_p13)
}
  0xe3   : > { %s5408_s20 = smov 4   ;;  %s3765_s30 = smul.u32 640, %s4463_s28 }
  0xe4   : > { %3819 = dma.hbm_to_vmem [thread:$0]  (!%p4792_p4), %s4786_s4, 128, %s4788_s18, %s456_s2, %s5396_s17, %s5396_s17, %s5408_s20  }
  0xe5   : > { %s480_s23 = scalar_lea.vmem [#allocation5], %s3764_s13  ;;  %s4835_s6 = scalar_lea.hbm %s5354_s1, %s3765_s30 }
  0xe6   : > { %s488_s24 = sshll.u32 %s480_s23, 4  ;;  %s5409_s0 = sand.u32 1, %s4463_s28   ;;  %s4837_s24 = int_to_ptr.vmem [resolvable:$true] %s488_s24 }
  0xe7   : > { %s4841_s8 = scalar_lea.sflag [#allocation6], %s5409_s0  ;;  %s4347_s11 = scalar_lea.hbm %s4835_s6, 640 }
  0xe8   : > { %p4348_p7 = scmp.ne.s32.totalorder %s4835_s6, %s4347_s11  ;;  %s4352_s5 = scalar_lea.hbm %s5354_s1, 1280 }
  0xe9   : > { %p4353_p0 = scmp.lt.u32.totalorder %s4835_s6, %s5354_s1  ;;  %p4354_p2 = scmp.lt.u32.totalorder %s4352_s5, %s4347_s11 }
  0xea   : > { %p4350_p9 = pnand %p4348_p7, %p4319_p8  ;;  %p4356_p10 = scmp.lt.u32.totalorder %s4347_s11, %s4835_s6 }
  0xeb   : > { %p4355_p5 = por %p4354_p2, %p4353_p0 }
  0xec   : > { %p4351_p3 = pneg %p4350_p9 }
  0xed   : > { %p4357_p1 = por %p4356_p10, %p4355_p5 }
  0xef   : > { %p4358_p11 = pnand %p4357_p1, %p4351_p3 }
  0xf1   : > { %4361 = shalt.err (!%p4358_p11)
}
  0xf2   : > { %s4362_s0 = scalar_lea.vmem %s4837_s24, 640  ;;  %s4476_s2 = smov [#allocation5]  }
  0xf3   : > { %p4363_p12 = scmp.ne.s32.totalorder %s4837_s24, %s4362_s0  ;;  %s4367_s20 = sshll.u32 %s4476_s2, 4  ;;  %s4368_s20 = int_to_ptr.vmem [resolvable:$false] %s4367_s20 }
  0xf4   : > { %s4369_s30 = scalar_lea.vmem %s4368_s20, 1280  ;;  %p4370_p9 = scmp.lt.s32.totalorder %s4837_s24, %s4368_s20 }
  0xf5   : > { %p4365_p13 = pnand %p4363_p12, %p4319_p8  ;;  %p4371_p0 = scmp.lt.s32.totalorder %s4369_s30, %s4362_s0 }
  0xf7   : > { %p4366_p7 = pneg %p4365_p13  ;;  %p4372_p2 = por %p4371_p0, %p4370_p9 }
  0xf9   : > { %p4373_p5 = pnand %p4372_p2, %p4366_p7 }
  0xfb   : > { %4376 = shalt.err (!%p4373_p5)
}
  0xfc   : > { %s4477_s11 = smov 320   ;;  %s4478_s23 = smov 20  }
  0xfd   : > { %3822 = dma.hbm_to_vmem [thread:$0]  (!%p4792_p4), %s4835_s6, 640, %s4837_s24, %s4841_s8, %s4477_s11, %s4477_s11, %s4478_s23  }
  0xfe   : > { %p5410_p8 = scmp.ne.s32.totalorder %s5390_s15, 0 }
  0xff   : > { %s4870_s22 = sand.u32 (!%p5410_p8), 1, %s4455_s26  }
 0x100   : > { %500 = sbr.rel (%p5410_p8) target bundleno = 2629 (0xa45), region = 72  ;;  %s3087_s19 = sshll.u32 (!%p5410_p8), %s4870_s22, 3 }
 0x101   : > { %s503_s13 = scalar_lea.sflag (!%p5410_p8), [#allocation3], %s4870_s22  ;;  %s4874_s17 = scalar_lea.vmem (!%p5410_p8), [#allocation2], %s3087_s19 }
 0x107   : > { %4422 = dma.done.wait (%p4764_p6), %s503_s13, 128  }
 0x108   : > { %4424 = vsyncadd (%p4764_p6), %s503_s13, 4294967168  ;;  %s511_s8 = sand.u32 1, %s4576_s14   ;;  %s3766_s15 = smul.u32 40, %s4870_s22 }
 0x109   : > { %s512_s10 = scalar_lea.sflag [#allocation6], %s511_s8 }
 0x10a   : > { %s4882_s24 = scalar_lea.vmem [#allocation5], %s3766_s15 }
 0x10b   : > { %4426 = dma.done.wait (%p4764_p6), %s512_s10, 640  }
 0x10c   : > { %4428 = vsyncadd (%p4764_p6), %s512_s10, 4294966656  ;;  %p5411_p4 = scmp.eq.s32.totalorder %s4576_s14, 0 }
 0x10e   : > { %4430 = dma.done.wait (%p5411_p4), [#allocation6], 5120   ;;  %p5412_p3 = pmov %p5411_p4 }
 0x110   : > { %4432 = vsyncadd (%p5412_p3), [#allocation6], 4294962176  ;;  %p5413_p10 = pmov %p5412_p3 }
 0x111   : > { %p5414_p1 = pmov %p5412_p3 }
 0x112   : > { %4434 = dma.done.wait (%p5413_p10), [#allocation9], 12288  }
 0x113   : > { %4436 = vsyncadd (%p5414_p1), [#allocation9], 4294955008  ;;  %p5415_p11 = pmov %p5414_p1 }
 0x114   : > { %p5416_p12 = pmov %p5414_p1 }
 0x115   : > { %4438 = dma.done.wait (%p5415_p11), [#allocation12], 2048  }
 0x116   : > { %4440 = vsyncadd (%p5416_p12), [#allocation12], 4294965248  ;;  %p5417_p6 = pmov %p5414_p1 }
 0x117   : > { %p5418_p13 = pmov %p5414_p1 }
 0x118   : > { %4442 = dma.done.wait (%p5417_p6), [#allocation15], 2048  }
 0x119   : > { %4444 = vsyncadd (%p5418_p13), [#allocation15], 4294965248  ;;  %v4479_v0 = vmov 0.0   ;;  %vm4480_vm0 = vmmov 0   ;;  %v4481_v1 = vmov 0   ;;  %v3890_v2 = vld [vmem:[#allocation7] sm:$0xff]   ;;  %v643_v50 = vlaneseq }
 0x11a   : > { %3410 = vmatprep.subr.bf16.mxu1 %v4479_v0  ;;  %3426 = vmatprep.mubr.msk.bf16.mxu1 %vm4480_vm0, %v4479_v0  ;;  %v3891_v3 = vld [vmem:[#allocation7 + $0x8] sm:$0xff]   ;;  %v3892_v4 = vld [vmem:[#allocation7 + $0x10] sm:$0xff]   ;;  %v3893_v5 = vld [vmem:[#allocation7 + $0x18] sm:$0xff]   ;;  %s5419_s18 = sld [smem:[#allocation29_spill]]  ;;  %s5420_s20 = sld [smem:[#allocation27_spill]] }
 0x11b   : > { %771 = vmatprep.mubr.bf16.mxu0 %v4481_v1  ;;  %3411 = vmatpush3.bf16.msra.mxu1 %v3890_v2  ;;  %v3899_v6 = vld [vmem:[#allocation10 + $0x4] ss:$8 sps:$4 sm:$0xff]   ;;  %v3901_v7 = vld [vmem:[#allocation10] ss:$8 sps:$4 sm:$0xff]   ;;  %v3902_v8 = vld [vmem:[#allocation10 + $0x14] ss:$8 sps:$4 sm:$0xff]  }
 0x11c   : > { %3412 = vmatprep.subr.bf16.mxu1 %v4479_v0  ;;  %739 = vmatprep.subr.bf16.mxu0 %v3899_v6  ;;  %v3904_v9 = vld [vmem:[#allocation10 + $0x10] ss:$8 sps:$4 sm:$0xff]   ;;  %v3905_v10 = vld [vmem:[#allocation10 + $0x24] ss:$8 sps:$4 sm:$0xff]   ;;  %v3907_v12 = vld [vmem:[#allocation10 + $0x20] ss:$8 sps:$4 sm:$0xff]  }
 0x11d   : > { %740 = vmatpush1.bf16.msra.mxu0 %v3901_v7  ;;  %v3894_v11 = vld [vmem:[#allocation7 + $0x20] sm:$0xff]   ;;  %v3908_v13 = vld [vmem:[#allocation10 + $0x34] ss:$8 sps:$4 sm:$0xff]   ;;  %v3895_v14 = vld [vmem:[#allocation7 + $0x28] sm:$0xff]   ;;  %v4949_v53 = vshrl.u32 %v643_v50, 7  ;;  %s5421_s19 = sld [smem:[#allocation31_spill]] }
 0x11e   : > { %741 = vmatprep.subr.bf16.mxu0 %v3902_v8  ;;  %v3910_v15 = vld [vmem:[#allocation10 + $0x30] ss:$8 sps:$4 sm:$0xff]   ;;  %v3911_v17 = vld [vmem:[#allocation10 + $0x44] ss:$8 sps:$4 sm:$0xff]   ;;  %v3913_v18 = vld [vmem:[#allocation10 + $0x40] ss:$8 sps:$4 sm:$0xff]  }
 0x11f   : > { %3413 = vmatpush3.bf16.msra.mxu1 %v3891_v3  ;;  %v3896_v16 = vld [vmem:[#allocation7 + $0x30] sm:$0xff]   ;;  %v3897_v20 = vld [vmem:[#allocation7 + $0x38] sm:$0xff]   ;;  %v3917_v23 = vld [vmem:[#allocation10 + $0x64] ss:$8 sps:$4 sm:$0xff]   ;;  %v4952_v60 = vsub.s32 1, %v4949_v53  ;;  %s5422_s8 = sld [smem:[#allocation32_spill]] }
 0x120   : > { %3414 = vmatprep.subr.bf16.mxu1 %v4479_v0  ;;  %v3914_v19 = vld [vmem:[#allocation10 + $0x54] ss:$8 sps:$4 sm:$0xff]   ;;  %v3916_v21 = vld [vmem:[#allocation10 + $0x50] ss:$8 sps:$4 sm:$0xff]   ;;  %v3919_v24 = vld [vmem:[#allocation10 + $0x60] ss:$8 sps:$4 sm:$0xff]  }
 0x121   : > { %742 = vmatpush1.bf16.msra.mxu0 %v3904_v9  ;;  %v3898_v22 = vld [vmem:[%s4882_s24] ss:$20 sps:$4 sm:$0xff]   ;;  %v3920_v25 = vld [vmem:[#allocation10 + $0x74] ss:$8 sps:$4 sm:$0xff]   ;;  %v3924_v29 = vld [vmem:[#allocation8] ss:$8 sps:$4 sm:$0xff]  }
 0x122   : > { %743 = vmatprep.subr.bf16.mxu0 %v3905_v10  ;;  %v3922_v26 = vld [vmem:[#allocation10 + $0x70] ss:$8 sps:$4 sm:$0xff]   ;;  %v3926_v27 = vld [vmem:[#allocation8 + $0x4] ss:$8 sps:$4 sm:$0xff]   ;;  %v3929_v30 = vld [vmem:[#allocation8 + $0x14] ss:$8 sps:$4 sm:$0xff]  }
 0x123   : > { %3415 = vmatpush3.bf16.msra.mxu1 %v3892_v4  ;;  %v3923_v28 = vld [vmem:[%s4874_s17] sm:$0xff]   ;;  %v3927_v31 = vld [vmem:[#allocation8 + $0x10] ss:$8 sps:$4 sm:$0xff]   ;;  %v3935_v34 = vld [vmem:[#allocation8 + $0x34] ss:$8 sps:$4 sm:$0xff]   ;;  %s3094_s15 = sshll.u32 %s4870_s22, 4 }
 0x124   : > { %3416 = vmatprep.subr.bf16.mxu1 %v4479_v0  ;;  %v3932_v32 = vld [vmem:[#allocation8 + $0x24] ss:$8 sps:$4 sm:$0xff]   ;;  %v3930_v33 = vld [vmem:[#allocation8 + $0x20] ss:$8 sps:$4 sm:$0xff]   ;;  %v3933_v35 = vld [vmem:[#allocation8 + $0x30] ss:$8 sps:$4 sm:$0xff]  }
 0x125   : > { %744 = vmatpush1.bf16.msra.mxu0 %v3907_v12  ;;  %v3938_v36 = vld [vmem:[#allocation8 + $0x44] ss:$8 sps:$4 sm:$0xff]   ;;  %v3936_v37 = vld [vmem:[#allocation8 + $0x40] ss:$8 sps:$4 sm:$0xff]   ;;  %v3941_v38 = vld [vmem:[#allocation8 + $0x54] ss:$8 sps:$4 sm:$0xff]  }
 0x126   : > { %745 = vmatprep.subr.bf16.mxu0 %v3908_v13  ;;  %v3939_v39 = vld [vmem:[#allocation8 + $0x50] ss:$8 sps:$4 sm:$0xff]   ;;  %v3944_v40 = vld [vmem:[#allocation8 + $0x64] ss:$8 sps:$4 sm:$0xff]   ;;  %v3942_v41 = vld [vmem:[#allocation8 + $0x60] ss:$8 sps:$4 sm:$0xff]  }
 0x127   : > { %3417 = vmatpush3.bf16.msra.mxu1 %v3893_v5  ;;  %v3947_v42 = vld [vmem:[#allocation8 + $0x74] ss:$8 sps:$4 sm:$0xff]   ;;  %v3945_v43 = vld [vmem:[#allocation8 + $0x70] ss:$8 sps:$4 sm:$0xff]   ;;  %v4922_v44 = vld [vmem:[#allocation13] sm:$0xff]   ;;  %s3274_s10 = sshll.u32 %s4576_s14, 8 }
 0x128   : > { %3418 = vmatprep.subr.bf16.mxu1 %v4479_v0  ;;  %v4925_v45 = vld [vmem:[#allocation13 + $0x8] sm:$0xff]   ;;  %v4929_v46 = vld [vmem:[#allocation13 + $0x10] sm:$0xff]   ;;  %v4933_v47 = vld [vmem:[#allocation13 + $0x18] sm:$0xff]   ;;  %s586_s9 = scalar_lea.vmem [#allocation16], %s3094_s15  ;;  %s5423_s4 = sld [smem:[#allocation34_spill]] }
 0x129   : > { %746 = vmatpush1.bf16.msra.mxu0 %v3910_v15  ;;  %v4937_v48 = vld [vmem:[#allocation13 + $0x20] sm:$0xff]   ;;  %v4941_v49 = vld [vmem:[#allocation13 + $0x28] sm:$0xff]   ;;  %s2905_s14 = scalar_lea.sflag [#allocation4], %s4870_s22  ;;  %p5424_p9 = scmp.ne.s32.totalorder %s5404_s29, 0 }
 0x12a   : > { %747 = vmatprep.subr.bf16.mxu0 %v3911_v17  ;;  %v3112_v51 = vld [vmem:[%s5356_s3] ss:$0 sm:$0xff]  ;;  %s4482_s2 = smov [#allocation16]  }
 0x12b   : > { %3419 = vmatpush3.bf16.msra.mxu1 %v3894_v11  ;;  %v4957_v63 = vld [vmem:[%s5419_s18] sm:$0x3]  ;;  %s4381_s30 = sshll.u32 %s4482_s2, 4  ;;  %s4382_s30 = int_to_ptr.vmem [resolvable:$false] %s4381_s30 }
 0x12c   : > { %3420 = vmatprep.subr.bf16.mxu1 %v4479_v0  ;;  %v650_v4 = vrot.slane %v4957_v63, %v4952_v60  ;;  %s4383_s11 = scalar_lea.vmem %s4382_s30, 512 }
 0x12d   : > { %748 = vmatpush1.bf16.msra.mxu0 %v3913_v18 }
 0x12e   : > { %749 = vmatprep.subr.bf16.mxu0 %v3914_v19  ;;  %s5307_s18 = scalar_lea.hbm %s5423_s4, %s3274_s10 }
 0x12f   : > { %3421 = vmatpush3.bf16.msra.mxu1 %v3895_v14 }
 0x130   : > { %3422 = vmatprep.subr.bf16.mxu1 %v4479_v0 }
 0x131   : > { %750 = vmatpush1.bf16.msra.mxu0 %v3916_v21 }
 0x132   : > { %751 = vmatprep.subr.bf16.mxu0 %v3917_v23 }
 0x133   : > { %3423 = vmatpush3.bf16.msra.mxu1 %v3896_v16 }
 0x134   : > { %3424 = vmatprep.subr.bf16.mxu1 %v4479_v0 }
 0x135   : > { %752 = vmatpush1.bf16.msra.mxu0 %v3919_v24  ;;  %v3948_v24 = vld [vmem:[#allocation7 + $0x40] sm:$0xff]  }
 0x136   : > { %753 = vmatprep.subr.bf16.mxu0 %v3920_v25 }
 0x137   : > { %3425 = vmatpush3.bf16.msra.mxu1 %v3897_v20 }
 0x138   : > { %3430 = vmatprep.subr.bf16.mxu1 %v4479_v0 }
 0x139   : > { %754 = vmatpush1.bf16.msra.mxu0 %v3922_v26  ;;  %v3949_v26 = vld [vmem:[#allocation7 + $0x48] sm:$0xff]  }
 0x13a   : > { %3427 = vmatmul.mubr.bf16.vlgmr.msra.gmra.mrb[0].mxu1 %v3898_v22  ;;  %1029 = vmatprep.subr.bf16.mxu0 %v3926_v27  ;;  %v3950_v27 = vld [vmem:[#allocation7 + $0x50] sm:$0xff]  }
 0x13b   : > { %3446 = vmatprep.mubr.msk.bf16.mxu1 %vm4480_vm0, %v4479_v0  ;;  %3431 = vmatpush3.bf16.msra.mxu1 %v4922_v44 }
 0x13c   : > { %772 = vmatmul.mubr.bf16.vlgmr.msra.gmra.mrb[0].mxu0 %v3923_v28  ;;  %3432 = vmatprep.subr.bf16.mxu1 %v4479_v0  ;;  %v3951_v28 = vld [vmem:[#allocation7 + $0x58] sm:$0xff]  }
 0x13d   : > { %1030 = vmatpush1.bf16.msra.mxu0 %v3924_v29  ;;  %1061 = vmatprep.mubr.bf16.mxu0 %v4481_v1  ;;  %v3952_v29 = vld [vmem:[#allocation7 + $0x60] sm:$0xff]  }
 0x13e   : > { %1031 = vmatprep.subr.bf16.mxu0 %v3929_v30  ;;  %v3953_v30 = vld [vmem:[#allocation7 + $0x68] sm:$0xff]  }
 0x13f   : > { %3433 = vmatpush3.bf16.msra.mxu1 %v4925_v45 }
 0x140   : > { %3434 = vmatprep.subr.bf16.mxu1 %v4479_v0 }
 0x141   : > { %1032 = vmatpush1.bf16.msra.mxu0 %v3927_v31  ;;  %v3954_v31 = vld [vmem:[#allocation7 + $0x70] sm:$0xff]  }
 0x142   : > { %1033 = vmatprep.subr.bf16.mxu0 %v3932_v32  ;;  %v3955_v32 = vld [vmem:[#allocation7 + $0x78] sm:$0xff]  }
 0x143   : > { %3435 = vmatpush3.bf16.msra.mxu1 %v4929_v46 }
 0x144   : > { %3436 = vmatprep.subr.bf16.mxu1 %v4479_v0 }
 0x145   : > { %1034 = vmatpush1.bf16.msra.mxu0 %v3930_v33  ;;  %v3956_v33 = vld [vmem:[%s4882_s24 + $0x4] ss:$20 sps:$4 sm:$0xff]  }
 0x146   : > { %1035 = vmatprep.subr.bf16.mxu0 %v3935_v34  ;;  %v4994_v34 = vld [vmem:[#allocation13 + $0x30] sm:$0xff]  }
 0x147   : > { %3437 = vmatpush3.bf16.msra.mxu1 %v4933_v47 }
 0x148   : > { %3438 = vmatprep.subr.bf16.mxu1 %v4479_v0 }
 0x149   : > { %1036 = vmatpush1.bf16.msra.mxu0 %v3933_v35  ;;  %v5000_v35 = vld [vmem:[#allocation13 + $0x38] sm:$0xff]  }
 0x14a   : > { %1037 = vmatprep.subr.bf16.mxu0 %v3938_v36  ;;  %v3967_v36 = vld [vmem:[#allocation8 + $0x84] ss:$8 sps:$4 sm:$0xff]  }
 0x14b   : > { %3439 = vmatpush3.bf16.msra.mxu1 %v4937_v48 }
 0x14c   : > { %3440 = vmatprep.subr.bf16.mxu1 %v4479_v0 }
 0x14d   : > { %1038 = vmatpush1.bf16.msra.mxu0 %v3936_v37  ;;  %v937_v37 = vld [vmem:[%s5420_s20] sm:$0x3] }
 0x14e   : > { %1039 = vmatprep.subr.bf16.mxu0 %v3941_v38  ;;  %v5008_v38 = vsub.s32 0, %v4949_v53 }
 0x14f   : > { %3441 = vmatpush3.bf16.msra.mxu1 %v4941_v49 }
 0x150   : > { %3442 = vmatprep.subr.bf16.mxu1 %v4479_v0 }
 0x151   : > { %1040 = vmatpush1.bf16.msra.mxu0 %v3939_v39  ;;  %v942_v39 = vrot.slane %v937_v37, %v5008_v38 }
 0x152   : > { %1041 = vmatprep.subr.bf16.mxu0 %v3944_v40  ;;  %v646_v40 = vrot.slane %v4957_v63, %v5008_v38  ;;  %v3971_v63 = vld [vmem:[#allocation8 + $0xa0] ss:$8 sps:$4 sm:$0xff]  }
 0x153   : > { %3443 = vmatpush3.bf16.msra.mxu1 %v4994_v34 }
 0x154   : > { %3444 = vmatprep.subr.bf16.mxu1 %v4479_v0 }
 0x155   : > { %1042 = vmatpush1.bf16.msra.mxu0 %v3942_v41 }
 0x156   : > { %1043 = vmatprep.subr.bf16.mxu0 %v3947_v42 }
 0x157   : > { %3445 = vmatpush3.bf16.msra.mxu1 %v5000_v35 }
 0x158   : > { %1417 = vmatprep.subr.bf16.mxu1 %v3967_v36 }
 0x159   : > { %1044 = vmatpush1.bf16.msra.mxu0 %v3945_v43 }
 0x15a   : > { %3450 = vmatprep.subr.bf16.mxu0 %v4479_v0 }
 0x20d   : > { %v895_v52 = vpop.f32.mrb[0].mxu1 }
 0x20e   : > { %v896_v54 = vadd.f32 %v3112_v51, %v895_v52  ;;  %v3428_v55 = vpop.f32.mrb[1].mxu1 }
 0x20f   : > { %v898_v56 = vpop.f32.mrb[2].mxu1  ;;  %v4961_v7 = vpop.f32.mrb[0].mxu0 }
 0x210   : > { %v904_v57 = vmul.f32 0.044715, %v896_v54  ;;  %v899_v58 = vadd.f32 %v3112_v51, %v898_v56  ;;  %v3429_v59 = vpop.f32.mrb[3].mxu1  ;;  %v775_v10 = vpop.f32.mrb[1].mxu0  ;;  %v902_v19 = vmul.f32 0.5, %v896_v54  ;;  %v5016_v51 = vadd.f32 %v4961_v7, %v646_v40 }
 0x211   : > { %v4963_v11 = vadd.f32 %v775_v10, %v650_v4  ;;  %v4965_v12 = vpop.f32.mrb[2].mxu0  ;;  %v3970_v59 = vld [vmem:[#allocation8 + $0x94] ss:$8 sps:$4 sm:$0xff]   ;;  %v3980_v7 = vld [vmem:[#allocation8 + $0xd0] ss:$8 sps:$4 sm:$0xff]  }
 0x212   : > { %v906_v61 = vmul.f32 %v904_v57, %v896_v54  ;;  %v905_v62 = vmul.f32 0.044715, %v899_v58  ;;  %v779_v14 = vpop.f32.mrb[3].mxu0  ;;  %v903_v20 = vmul.f32 0.5, %v899_v58  ;;  %v5019_v52 = vadd.f32 %v4965_v12, %v646_v40  ;;  %v3965_v57 = vld [vmem:[#allocation8 + $0x80] ss:$8 sps:$4 sm:$0xff]  }
 0x213   : > { %v4967_v15 = vadd.f32 %v779_v14, %v650_v4  ;;  %v3979_v4 = vld [vmem:[#allocation8 + $0xc4] ss:$8 sps:$4 sm:$0xff]   ;;  %v3983_v10 = vld [vmem:[#allocation8 + $0xe0] ss:$8 sps:$4 sm:$0xff]   ;;  %v3988_v12 = vld [vmem:[#allocation8 + $0xf4] ss:$8 sps:$4 sm:$0xff]  }
 0x214   : > { %v908_v2 = vmul.f32 %v906_v61, %v896_v54  ;;  %v907_v3 = vmul.f32 %v905_v62, %v899_v58  ;;  %v3968_v61 = vld [vmem:[#allocation8 + $0x90] ss:$8 sps:$4 sm:$0xff]   ;;  %v3973_v62 = vld [vmem:[#allocation8 + $0xa4] ss:$8 sps:$4 sm:$0xff]  }
 0x216   : > { %v910_v5 = vadd.f32 %v908_v2, %v896_v54  ;;  %v909_v6 = vmul.f32 %v907_v3, %v899_v58  ;;  %v3976_v2 = vld [vmem:[#allocation8 + $0xb4] ss:$8 sps:$4 sm:$0xff]   ;;  %v3974_v3 = vld [vmem:[#allocation8 + $0xb0] ss:$8 sps:$4 sm:$0xff]  }
 0x218   : > { %v912_v8 = vmul.f32 0.7978846, %v910_v5  ;;  %v911_v9 = vadd.f32 %v909_v6, %v899_v58  ;;  %v3977_v5 = vld [vmem:[#allocation8 + $0xc0] ss:$8 sps:$4 sm:$0xff]   ;;  %v3982_v6 = vld [vmem:[#allocation8 + $0xd4] ss:$8 sps:$4 sm:$0xff]  }
 0x21a   : > { %4096 = vtanh.f32 %v912_v8  ;;  %v913_v13 = vmul.f32 0.7978846, %v911_v9  ;;  %v3985_v8 = vld [vmem:[#allocation8 + $0xe4] ss:$8 sps:$4 sm:$0xff]   ;;  %v3147_v9 = vld [vmem:[%s5356_s3 + $0x1] ss:$0 sm:$0xff] }
 0x21c   : > { %4098 = vtanh.f32 %v913_v13 }
 0x224   : > { %v4097_v16 = vpop.eup %4096 }
 0x225   : > { %v916_v17 = vadd.f32 1.0, %v4097_v16 }
 0x226   : > { %v4099_v18 = vpop.eup %4098 }
 0x227   : > { %v917_v21 = vadd.f32 1.0, %v4099_v18  ;;  %v918_v22 = vmul.f32 %v916_v17, %v902_v19  ;;  %v3986_v18 = vld [vmem:[#allocation8 + $0xf0] ss:$8 sps:$4 sm:$0xff]  }
 0x229   : > { %v919_v23 = vmul.f32 %v917_v21, %v903_v20 }
 0x22b   : > { %v920_v25 = vpack.c.bf16 %v919_v23, %v918_v22 }
 0x22d   : > { %1062 = vmatmul.mubr.bf16.vlgmr.msra.gmra.mrb[4].mxu0 %v920_v25 }
 0x22e   : > { %3451 = vmatpush3.bf16.msra.mxu0 %v3948_v24  ;;  %3466 = vmatprep.mubr.msk.bf16.mxu0 %vm4480_vm0, %v4479_v0 }
 0x22f   : > { %3452 = vmatprep.subr.bf16.mxu0 %v4479_v0 }
 0x232   : > { %3453 = vmatpush3.bf16.msra.mxu0 %v3949_v26 }
 0x233   : > { %3454 = vmatprep.subr.bf16.mxu0 %v4479_v0 }
 0x236   : > { %3455 = vmatpush3.bf16.msra.mxu0 %v3950_v27 }
 0x237   : > { %3456 = vmatprep.subr.bf16.mxu0 %v4479_v0 }
 0x23a   : > { %3457 = vmatpush3.bf16.msra.mxu0 %v3951_v28 }
 0x23b   : > { %3458 = vmatprep.subr.bf16.mxu0 %v4479_v0 }
 0x23e   : > { %3459 = vmatpush3.bf16.msra.mxu0 %v3952_v29 }
 0x23f   : > { %3460 = vmatprep.subr.bf16.mxu0 %v4479_v0 }
 0x242   : > { %3461 = vmatpush3.bf16.msra.mxu0 %v3953_v30 }
 0x243   : > { %3462 = vmatprep.subr.bf16.mxu0 %v4479_v0 }
 0x246   : > { %3463 = vmatpush3.bf16.msra.mxu0 %v3954_v31 }
 0x247   : > { %3464 = vmatprep.subr.bf16.mxu0 %v4479_v0 }
 0x24a   : > { %3465 = vmatpush3.bf16.msra.mxu0 %v3955_v32 }
 0x24b   : > { %3470 = vmatprep.subr.bf16.mxu0 %v4479_v0 }
 0x24d   : > { %3467 = vmatmul.mubr.bf16.vlgmr.msra.gmra.mrb[8].mxu0 %v3956_v33 }
 0x24e   : > { %3471 = vmatpush3.bf16.msra.mxu0 %v4922_v44  ;;  %3486 = vmatprep.mubr.msk.bf16.mxu0 %vm4480_vm0, %v4479_v0 }
 0x24f   : > { %3472 = vmatprep.subr.bf16.mxu0 %v4479_v0 }
 0x252   : > { %3473 = vmatpush3.bf16.msra.mxu0 %v4925_v45 }
 0x253   : > { %3474 = vmatprep.subr.bf16.mxu0 %v4479_v0 }
 0x256   : > { %3475 = vmatpush3.bf16.msra.mxu0 %v4929_v46 }
 0x257   : > { %3476 = vmatprep.subr.bf16.mxu0 %v4479_v0 }
 0x25a   : > { %3477 = vmatpush3.bf16.msra.mxu0 %v4933_v47 }
 0x25b   : > { %3478 = vmatprep.subr.bf16.mxu0 %v4479_v0 }
 0x25e   : > { %3479 = vmatpush3.bf16.msra.mxu0 %v4937_v48 }
 0x25f   : > { %3480 = vmatprep.subr.bf16.mxu0 %v4479_v0 }
 0x262   : > { %3481 = vmatpush3.bf16.msra.mxu0 %v4941_v49 }
 0x263   : > { %3482 = vmatprep.subr.bf16.mxu0 %v4479_v0 }
 0x266   : > { %3483 = vmatpush3.bf16.msra.mxu0 %v4994_v34 }
 0x267   : > { %3484 = vmatprep.subr.bf16.mxu0 %v4479_v0 }
 0x26a   : > { %3485 = vmatpush3.bf16.msra.mxu0 %v5000_v35 }
 0x300   : > { %v1063_v41 = vpop.f32.mrb[4].mxu0 }
 0x301   : > { %v1064_v42 = vadd.f32 %v1063_v41, %v942_v39  ;;  %v5013_v43 = vpop.f32.mrb[5].mxu0 }
 0x302   : > { %v1067_v50 = vpop.f32.mrb[6].mxu0 }
 0x303   : > { %v1068_v54 = vadd.f32 %v1067_v50, %v942_v39  ;;  %v5021_v55 = vpop.f32.mrb[7].mxu0  ;;  %v1072_v53 = vmul.f32 %v1064_v42, %v5016_v51  ;;  %v3989_v42 = vld [vmem:[#allocation7 + $0x80] sm:$0xff]  }
 0x305   : > { %v1073_v56 = vmul.f32 %v1068_v54, %v5019_v52  ;;  %v3990_v54 = vld [vmem:[#allocation7 + $0x88] sm:$0xff]  }
 0x307   : > { %v1074_v58 = vpack.c.bf16 %v1073_v56, %v1072_v53  ;;  %v3991_v53 = vld [vmem:[#allocation7 + $0x90] sm:$0xff]   ;;  %v3992_v56 = vld [vmem:[#allocation7 + $0x98] sm:$0xff]  }
 0x309   : > { %3447 = vmatmul.mubr.bf16.vlgmr.msra.gmra.mrb[4].mxu1 %v1074_v58  ;;  %v3994_v58 = vld [vmem:[#allocation7 + $0xa8] sm:$0xff]  }
 0x30a   : > { %1418 = vmatpush1.bf16.msra.mxu1 %v3965_v57  ;;  %1449 = vmatprep.mubr.bf16.mxu1 %v4481_v1  ;;  %v3993_v57 = vld [vmem:[#allocation7 + $0xa0] sm:$0xff]  }
 0x30b   : > { %1419 = vmatprep.subr.bf16.mxu1 %v3970_v59  ;;  %v3995_v59 = vld [vmem:[#allocation7 + $0xb0] sm:$0xff]  }
 0x30e   : > { %1420 = vmatpush1.bf16.msra.mxu1 %v3968_v61  ;;  %v3996_v61 = vld [vmem:[#allocation7 + $0xb8] sm:$0xff]  }
 0x30f   : > { %1421 = vmatprep.subr.bf16.mxu1 %v3973_v62  ;;  %v3997_v62 = vld [vmem:[%s4882_s24 + $0x8] ss:$20 sps:$4 sm:$0xff]  }
 0x312   : > { %1422 = vmatpush1.bf16.msra.mxu1 %v3971_v63  ;;  %v4000_v63 = vld [vmem:[#allocation8 + $0x104] ss:$8 sps:$4 sm:$0xff]  }
 0x313   : > { %1423 = vmatprep.subr.bf16.mxu1 %v3976_v2  ;;  %1757 = vmatprep.subr.bf16.mxu0 %v4000_v63 }
 0x316   : > { %1424 = vmatpush1.bf16.msra.mxu1 %v3974_v3 }
 0x317   : > { %1425 = vmatprep.subr.bf16.mxu1 %v3979_v4 }
 0x31a   : > { %1426 = vmatpush1.bf16.msra.mxu1 %v3977_v5 }
 0x31b   : > { %1427 = vmatprep.subr.bf16.mxu1 %v3982_v6  ;;  %v3157_v6 = vld [vmem:[%s5420_s20 + $0x2] sm:$0x3] }
 0x31e   : > { %1428 = vmatpush1.bf16.msra.mxu1 %v3980_v7  ;;  %v1330_v7 = vrot.slane %v3157_v6, %v5008_v38 }
 0x31f   : > { %1429 = vmatprep.subr.bf16.mxu1 %v3985_v8  ;;  %v1334_v8 = vrot.slane %v3157_v6, %v4952_v60 }
 0x320   : > { %v1281_v13 = vpop.f32.mrb[8].mxu0 }
 0x321   : > { %v1282_v14 = vadd.f32 %v3147_v9, %v1281_v13  ;;  %v3468_v16 = vpop.f32.mrb[9].mxu0 }
 0x322   : > { %v1284_v17 = vpop.f32.mrb[10].mxu0  ;;  %1430 = vmatpush1.bf16.msra.mxu1 %v3983_v10 }
 0x323   : > { %v1290_v19 = vmul.f32 0.044715, %v1282_v14  ;;  %v1285_v20 = vadd.f32 %v3147_v9, %v1284_v17  ;;  %v3469_v21 = vpop.f32.mrb[11].mxu0  ;;  %1431 = vmatprep.subr.bf16.mxu1 %v3988_v12  ;;  %v1288_v36 = vmul.f32 0.5, %v1282_v14 }
 0x324   : > { %v3998_v21 = vld [vmem:[#allocation8 + $0x100] ss:$8 sps:$4 sm:$0xff]  }
 0x325   : > { %v1292_v22 = vmul.f32 %v1290_v19, %v1282_v14  ;;  %v1291_v23 = vmul.f32 0.044715, %v1285_v20  ;;  %v1289_v37 = vmul.f32 0.5, %v1285_v20 }
 0x326   : > { %1432 = vmatpush1.bf16.msra.mxu1 %v3986_v18 }
 0x327   : > { %v1294_v24 = vmul.f32 %v1292_v22, %v1282_v14  ;;  %v1293_v25 = vmul.f32 %v1291_v23, %v1285_v20  ;;  %3490 = vmatprep.subr.bf16.mxu1 %v4479_v0  ;;  %v4003_v23 = vld [vmem:[#allocation8 + $0x114] ss:$8 sps:$4 sm:$0xff]  }
 0x329   : > { %v1296_v26 = vadd.f32 %v1294_v24, %v1282_v14  ;;  %v1295_v27 = vmul.f32 %v1293_v25, %v1285_v20  ;;  %v4001_v24 = vld [vmem:[#allocation8 + $0x110] ss:$8 sps:$4 sm:$0xff]   ;;  %v4006_v25 = vld [vmem:[#allocation8 + $0x124] ss:$8 sps:$4 sm:$0xff]  }
 0x32b   : > { %v1298_v28 = vmul.f32 0.7978846, %v1296_v26  ;;  %v1297_v29 = vadd.f32 %v1295_v27, %v1285_v20  ;;  %v4004_v26 = vld [vmem:[#allocation8 + $0x120] ss:$8 sps:$4 sm:$0xff]   ;;  %v4009_v27 = vld [vmem:[#allocation8 + $0x134] ss:$8 sps:$4 sm:$0xff]  }
 0x32d   : > { %4100 = vtanh.f32 %v1298_v28  ;;  %v1299_v30 = vmul.f32 0.7978846, %v1297_v29  ;;  %v4007_v28 = vld [vmem:[#allocation8 + $0x130] ss:$8 sps:$4 sm:$0xff]   ;;  %v4012_v29 = vld [vmem:[#allocation8 + $0x144] ss:$8 sps:$4 sm:$0xff]  }
 0x32f   : > { %4102 = vtanh.f32 %v1299_v30  ;;  %v4010_v30 = vld [vmem:[#allocation8 + $0x140] ss:$8 sps:$4 sm:$0xff]  }
 0x337   : > { %v4101_v31 = vpop.eup %4100 }
 0x338   : > { %v1302_v32 = vadd.f32 1.0, %v4101_v31  ;;  %v4015_v31 = vld [vmem:[#allocation8 + $0x154] ss:$8 sps:$4 sm:$0xff]  }
 0x339   : > { %v4103_v33 = vpop.eup %4102 }
 0x33a   : > { %v1303_v39 = vadd.f32 1.0, %v4103_v33  ;;  %v1304_v40 = vmul.f32 %v1302_v32, %v1288_v36  ;;  %v4013_v32 = vld [vmem:[#allocation8 + $0x150] ss:$8 sps:$4 sm:$0xff]   ;;  %v4018_v33 = vld [vmem:[#allocation8 + $0x164] ss:$8 sps:$4 sm:$0xff]  }
 0x33b   : > { %v3175_v36 = vld [vmem:[%s5356_s3 + $0x2] ss:$0 sm:$0xff] }
 0x33c   : > { %v1305_v41 = vmul.f32 %v1303_v39, %v1289_v37  ;;  %v4016_v37 = vld [vmem:[#allocation8 + $0x160] ss:$8 sps:$4 sm:$0xff]   ;;  %v4021_v39 = vld [vmem:[#allocation8 + $0x174] ss:$8 sps:$4 sm:$0xff]  }
 0x33e   : > { %v1306_v50 = vpack.c.bf16 %v1305_v41, %v1304_v40 }
 0x340   : > { %1450 = vmatmul.mubr.bf16.vlgmr.msra.gmra.mrb[8].mxu1 %v1306_v50 }
 0x341   : > { %3491 = vmatpush3.bf16.msra.mxu1 %v3989_v42  ;;  %3506 = vmatprep.mubr.msk.bf16.mxu1 %vm4480_vm0, %v4479_v0 }
 0x342   : > { %3492 = vmatprep.subr.bf16.mxu1 %v4479_v0 }
 0x345   : > { %3493 = vmatpush3.bf16.msra.mxu1 %v3990_v54  ;;  %v4019_v54 = vld [vmem:[#allocation8 + $0x170] ss:$8 sps:$4 sm:$0xff]  }
 0x346   : > { %3494 = vmatprep.subr.bf16.mxu1 %v4479_v0 }
 0x349   : > { %3495 = vmatpush3.bf16.msra.mxu1 %v3991_v53 }
 0x34a   : > { %3496 = vmatprep.subr.bf16.mxu1 %v4479_v0 }
 0x34d   : > { %3497 = vmatpush3.bf16.msra.mxu1 %v3992_v56 }
 0x34e   : > { %3498 = vmatprep.subr.bf16.mxu1 %v4479_v0 }
 0x351   : > { %3499 = vmatpush3.bf16.msra.mxu1 %v3993_v57 }
 0x352   : > { %3500 = vmatprep.subr.bf16.mxu1 %v4479_v0 }
 0x355   : > { %3501 = vmatpush3.bf16.msra.mxu1 %v3994_v58 }
 0x356   : > { %3502 = vmatprep.subr.bf16.mxu1 %v4479_v0 }
 0x359   : > { %3503 = vmatpush3.bf16.msra.mxu1 %v3995_v59 }
 0x35a   : > { %3504 = vmatprep.subr.bf16.mxu1 %v4479_v0 }
 0x35d   : > { %3505 = vmatpush3.bf16.msra.mxu1 %v3996_v61 }
 0x35e   : > { %3510 = vmatprep.subr.bf16.mxu1 %v4479_v0 }
 0x360   : > { %3507 = vmatmul.mubr.bf16.vlgmr.msra.gmra.mrb[12].mxu1 %v3997_v62 }
 0x361   : > { %3511 = vmatpush3.bf16.msra.mxu1 %v4922_v44  ;;  %3526 = vmatprep.mubr.msk.bf16.mxu1 %vm4480_vm0, %v4479_v0 }
 0x362   : > { %3512 = vmatprep.subr.bf16.mxu1 %v4479_v0 }
 0x365   : > { %3513 = vmatpush3.bf16.msra.mxu1 %v4925_v45 }
 0x366   : > { %3514 = vmatprep.subr.bf16.mxu1 %v4479_v0 }
 0x369   : > { %3515 = vmatpush3.bf16.msra.mxu1 %v4929_v46 }
 0x36a   : > { %3516 = vmatprep.subr.bf16.mxu1 %v4479_v0 }
 0x36d   : > { %3517 = vmatpush3.bf16.msra.mxu1 %v4933_v47 }
 0x36e   : > { %3518 = vmatprep.subr.bf16.mxu1 %v4479_v0 }
 0x371   : > { %3519 = vmatpush3.bf16.msra.mxu1 %v4937_v48 }
 0x372   : > { %3520 = vmatprep.subr.bf16.mxu1 %v4479_v0 }
 0x375   : > { %3521 = vmatpush3.bf16.msra.mxu1 %v4941_v49 }
 0x376   : > { %3522 = vmatprep.subr.bf16.mxu1 %v4479_v0 }
 0x379   : > { %3523 = vmatpush3.bf16.msra.mxu1 %v4994_v34 }
 0x37a   : > { %3524 = vmatprep.subr.bf16.mxu1 %v4479_v0 }
 0x37d   : > { %3525 = vmatpush3.bf16.msra.mxu1 %v5000_v35 }
 0x3dc   : > { %v5058_v2 = vpop.f32.mrb[4].mxu1 }
 0x3dd   : > { %v3448_v3 = vpop.f32.mrb[5].mxu1 }
 0x3de   : > { %v5060_v4 = vpop.f32.mrb[6].mxu1 }
 0x3df   : > { %v3449_v5 = vpop.f32.mrb[7].mxu1 }
 0x413   : > { %v1451_v9 = vpop.f32.mrb[8].mxu1 }
 0x414   : > { %v1452_v10 = vadd.f32 %v1451_v9, %v1330_v7  ;;  %v1453_v12 = vpop.f32.mrb[9].mxu1 }
 0x415   : > { %v5067_v13 = vadd.f32 %v1453_v12, %v1334_v8  ;;  %v1455_v14 = vpop.f32.mrb[10].mxu1 }
 0x416   : > { %v1456_v16 = vadd.f32 %v1455_v14, %v1330_v7  ;;  %v1457_v17 = vpop.f32.mrb[11].mxu1  ;;  %v1460_v19 = vmul.f32 %v1452_v10, %v5016_v51 }
 0x417   : > { %v5069_v18 = vadd.f32 %v1457_v17, %v1334_v8 }
 0x418   : > { %v1461_v20 = vmul.f32 %v1456_v16, %v5019_v52 }
 0x41a   : > { %v1462_v22 = vpack.c.bf16 %v1461_v20, %v1460_v19  ;;  %v4022_v20 = vld [vmem:[#allocation7 + $0xc0] sm:$0xff]  }
 0x41c   : > { %3487 = vmatmul.mubr.bf16.vlgmr.msra.gmra.mrb[12].mxu0 %v1462_v22  ;;  %v4023_v22 = vld [vmem:[#allocation7 + $0xc8] sm:$0xff]  }
 0x41d   : > { %1758 = vmatpush1.bf16.msra.mxu0 %v3998_v21  ;;  %1789 = vmatprep.mubr.bf16.mxu0 %v4481_v1 }
 0x41e   : > { %1759 = vmatprep.subr.bf16.mxu0 %v4003_v23  ;;  %v4024_v23 = vld [vmem:[#allocation7 + $0xd0] sm:$0xff]  }
 0x421   : > { %1760 = vmatpush1.bf16.msra.mxu0 %v4001_v24  ;;  %v4025_v24 = vld [vmem:[#allocation7 + $0xd8] sm:$0xff]  }
 0x422   : > { %1761 = vmatprep.subr.bf16.mxu0 %v4006_v25  ;;  %v4026_v25 = vld [vmem:[#allocation7 + $0xe0] sm:$0xff]  }
 0x425   : > { %1762 = vmatpush1.bf16.msra.mxu0 %v4004_v26  ;;  %v4027_v26 = vld [vmem:[#allocation7 + $0xe8] sm:$0xff]  }
 0x426   : > { %1763 = vmatprep.subr.bf16.mxu0 %v4009_v27  ;;  %v4028_v27 = vld [vmem:[#allocation7 + $0xf0] sm:$0xff]  }
 0x429   : > { %1764 = vmatpush1.bf16.msra.mxu0 %v4007_v28  ;;  %v4029_v28 = vld [vmem:[#allocation7 + $0xf8] sm:$0xff]  }
 0x42a   : > { %1765 = vmatprep.subr.bf16.mxu0 %v4012_v29  ;;  %v4030_v29 = vld [vmem:[%s4882_s24 + $0xc] ss:$20 sps:$4 sm:$0xff]  }
 0x42d   : > { %1766 = vmatpush1.bf16.msra.mxu0 %v4010_v30  ;;  %v4033_v30 = vld [vmem:[#allocation8 + $0x184] ss:$8 sps:$4 sm:$0xff]  }
 0x42e   : > { %1767 = vmatprep.subr.bf16.mxu0 %v4015_v31  ;;  %2097 = vmatprep.subr.bf16.mxu1 %v4033_v30  ;;  %v4052_v30 = vld [vmem:[#allocation8 + $0x1f0] ss:$8 sps:$4 sm:$0xff]  }
 0x431   : > { %1768 = vmatpush1.bf16.msra.mxu0 %v4013_v32  ;;  %v5107_v32 = vmul.f32 0.5, %v5058_v2  ;;  %v3185_v2 = vld [vmem:[%s5420_s20 + $0x4] sm:$0x3] }
 0x432   : > { %1769 = vmatprep.subr.bf16.mxu0 %v4018_v33 }
 0x433   : > { %v1621_v40 = vpop.f32.mrb[12].mxu1 }
 0x434   : > { %v1622_v41 = vadd.f32 %v3175_v36, %v1621_v40  ;;  %v3508_v42 = vpop.f32.mrb[13].mxu1 }
 0x435   : > { %v1624_v50 = vpop.f32.mrb[14].mxu1  ;;  %1770 = vmatpush1.bf16.msra.mxu0 %v4016_v37 }
 0x436   : > { %v1630_v53 = vmul.f32 0.044715, %v1622_v41  ;;  %v1625_v56 = vadd.f32 %v3175_v36, %v1624_v50  ;;  %v3509_v57 = vpop.f32.mrb[15].mxu1  ;;  %1771 = vmatprep.subr.bf16.mxu0 %v4021_v39  ;;  %v1628_v12 = vmul.f32 0.5, %v1622_v41  ;;  %v5112_v39 = vmul.f32 0.5, %v5060_v4 }
 0x438   : > { %v1632_v58 = vmul.f32 %v1630_v53, %v1622_v41  ;;  %v1631_v59 = vmul.f32 0.044715, %v1625_v56  ;;  %v1629_v14 = vmul.f32 0.5, %v1625_v56  ;;  %v1674_v53 = vrot.slane %v3185_v2, %v4952_v60 }
 0x439   : > { %1772 = vmatpush1.bf16.msra.mxu0 %v4019_v54  ;;  %v1670_v54 = vrot.slane %v3185_v2, %v5008_v38 }
 0x43a   : > { %v1634_v61 = vmul.f32 %v1632_v58, %v1622_v41  ;;  %v1633_v62 = vmul.f32 %v1631_v59, %v1625_v56  ;;  %3530 = vmatprep.subr.bf16.mxu0 %v4479_v0 }
 0x43c   : > { %v1636_v63 = vadd.f32 %v1634_v61, %v1622_v41  ;;  %v1635_v3 = vmul.f32 %v1633_v62, %v1625_v56 }
 0x43e   : > { %v1638_v5 = vmul.f32 0.7978846, %v1636_v63  ;;  %v1637_v6 = vadd.f32 %v1635_v3, %v1625_v56 }
 0x440   : > { %4104 = vtanh.f32 %v1638_v5  ;;  %v1639_v7 = vmul.f32 0.7978846, %v1637_v6  ;;  %v4031_v6 = vld [vmem:[#allocation8 + $0x180] ss:$8 sps:$4 sm:$0xff]  }
 0x442   : > { %4106 = vtanh.f32 %v1639_v7 }
 0x44a   : > { %v4105_v8 = vpop.eup %4104 }
 0x44b   : > { %v1642_v9 = vadd.f32 1.0, %v4105_v8  ;;  %v4036_v8 = vld [vmem:[#allocation8 + $0x194] ss:$8 sps:$4 sm:$0xff]  }
 0x44c   : > { %v4107_v10 = vpop.eup %4106 }
 0x44d   : > { %v1643_v16 = vadd.f32 1.0, %v4107_v10  ;;  %v1644_v17 = vmul.f32 %v1642_v9, %v1628_v12  ;;  %v4034_v9 = vld [vmem:[#allocation8 + $0x190] ss:$8 sps:$4 sm:$0xff]   ;;  %v4039_v10 = vld [vmem:[#allocation8 + $0x1a4] ss:$8 sps:$4 sm:$0xff]  }
 0x44e   : > { %v4037_v12 = vld [vmem:[#allocation8 + $0x1a0] ss:$8 sps:$4 sm:$0xff]  }
 0x44f   : > { %v1645_v19 = vmul.f32 %v1643_v16, %v1629_v14  ;;  %v4042_v14 = vld [vmem:[#allocation8 + $0x1b4] ss:$8 sps:$4 sm:$0xff]   ;;  %v4040_v16 = vld [vmem:[#allocation8 + $0x1b0] ss:$8 sps:$4 sm:$0xff]  }
 0x451   : > { %v1646_v21 = vpack.c.bf16 %v1645_v19, %v1644_v17  ;;  %v4045_v17 = vld [vmem:[#allocation8 + $0x1c4] ss:$8 sps:$4 sm:$0xff]   ;;  %v4043_v19 = vld [vmem:[#allocation8 + $0x1c0] ss:$8 sps:$4 sm:$0xff]  }
 0x453   : > { %1790 = vmatmul.mubr.bf16.vlgmr.msra.gmra.mrb[16].mxu0 %v1646_v21  ;;  %v4046_v21 = vld [vmem:[#allocation8 + $0x1d0] ss:$8 sps:$4 sm:$0xff]  }
 0x454   : > { %3531 = vmatpush3.bf16.msra.mxu0 %v4022_v20  ;;  %3546 = vmatprep.mubr.msk.bf16.mxu0 %vm4480_vm0, %v4479_v0  ;;  %v4048_v20 = vld [vmem:[#allocation8 + $0x1d4] ss:$8 sps:$4 sm:$0xff]  }
 0x455   : > { %3532 = vmatprep.subr.bf16.mxu0 %v4479_v0 }
 0x458   : > { %3533 = vmatpush3.bf16.msra.mxu0 %v4023_v22  ;;  %v4051_v22 = vld [vmem:[#allocation8 + $0x1e4] ss:$8 sps:$4 sm:$0xff]  }
 0x459   : > { %3534 = vmatprep.subr.bf16.mxu0 %v4479_v0 }
 0x45c   : > { %3535 = vmatpush3.bf16.msra.mxu0 %v4024_v23  ;;  %v3203_v23 = vld [vmem:[%s5356_s3 + $0x3] ss:$0 sm:$0xff] }
 0x45d   : > { %3536 = vmatprep.subr.bf16.mxu0 %v4479_v0 }
 0x460   : > { %3537 = vmatpush3.bf16.msra.mxu0 %v4025_v24  ;;  %v4049_v24 = vld [vmem:[#allocation8 + $0x1e0] ss:$8 sps:$4 sm:$0xff]  }
 0x461   : > { %3538 = vmatprep.subr.bf16.mxu0 %v4479_v0 }
 0x464   : > { %3539 = vmatpush3.bf16.msra.mxu0 %v4026_v25  ;;  %v4054_v25 = vld [vmem:[#allocation8 + $0x1f4] ss:$8 sps:$4 sm:$0xff]  }
 0x465   : > { %3540 = vmatprep.subr.bf16.mxu0 %v4479_v0 }
 0x468   : > { %3541 = vmatpush3.bf16.msra.mxu0 %v4027_v26 }
 0x469   : > { %3542 = vmatprep.subr.bf16.mxu0 %v4479_v0 }
 0x46c   : > { %3543 = vmatpush3.bf16.msra.mxu0 %v4028_v27 }
 0x46d   : > { %3544 = vmatprep.subr.bf16.mxu0 %v4479_v0 }
 0x470   : > { %3545 = vmatpush3.bf16.msra.mxu0 %v4029_v28 }
 0x471   : > { %3550 = vmatprep.subr.bf16.mxu0 %v4479_v0 }
 0x473   : > { %3547 = vmatmul.mubr.bf16.vlgmr.msra.gmra.mrb[20].mxu0 %v4030_v29 }
 0x474   : > { %3551 = vmatpush3.bf16.msra.mxu0 %v4922_v44  ;;  %3566 = vmatprep.mubr.msk.bf16.mxu0 %vm4480_vm0, %v4479_v0 }
 0x475   : > { %3552 = vmatprep.subr.bf16.mxu0 %v4479_v0 }
 0x478   : > { %3553 = vmatpush3.bf16.msra.mxu0 %v4925_v45 }
 0x479   : > { %3554 = vmatprep.subr.bf16.mxu0 %v4479_v0 }
 0x47c   : > { %3555 = vmatpush3.bf16.msra.mxu0 %v4929_v46 }
 0x47d   : > { %3556 = vmatprep.subr.bf16.mxu0 %v4479_v0 }
 0x480   : > { %3557 = vmatpush3.bf16.msra.mxu0 %v4933_v47 }
 0x481   : > { %3558 = vmatprep.subr.bf16.mxu0 %v4479_v0 }
 0x484   : > { %3559 = vmatpush3.bf16.msra.mxu0 %v4937_v48 }
 0x485   : > { %3560 = vmatprep.subr.bf16.mxu0 %v4479_v0 }
 0x488   : > { %3561 = vmatpush3.bf16.msra.mxu0 %v4941_v49 }
 0x489   : > { %3562 = vmatprep.subr.bf16.mxu0 %v4479_v0 }
 0x48c   : > { %3563 = vmatpush3.bf16.msra.mxu0 %v4994_v34 }
 0x48d   : > { %3564 = vmatprep.subr.bf16.mxu0 %v4479_v0 }
 0x490   : > { %3565 = vmatpush3.bf16.msra.mxu0 %v5000_v35 }
 0x4ef   : > { %v1497_v31 = vpop.f32.mrb[12].mxu0 }
 0x4f0   : > { %v5109_v33 = vmul.f32 0.5, %v1497_v31  ;;  %v3488_v36 = vpop.f32.mrb[13].mxu0 }
 0x4f1   : > { %v1500_v37 = vpop.f32.mrb[14].mxu0 }
 0x4f2   : > { %v2526_v40 = vmax.f32 %v5107_v32, %v5109_v33  ;;  %v5116_v41 = vmul.f32 0.5, %v1500_v37  ;;  %v3489_v42 = vpop.f32.mrb[15].mxu0 }
 0x4f4   : > { %v2527_v50 = vmax.f32 %v5112_v39, %v5116_v41 }
 0x526   : > { %v1791_v56 = vpop.f32.mrb[16].mxu0 }
 0x527   : > { %v1792_v4 = vadd.f32 %v1791_v56, %v1670_v54  ;;  %v1793_v57 = vpop.f32.mrb[17].mxu0 }
 0x528   : > { %v5125_v58 = vadd.f32 %v1793_v57, %v1674_v53  ;;  %v1795_v59 = vpop.f32.mrb[18].mxu0 }
 0x529   : > { %v1796_v61 = vadd.f32 %v1795_v59, %v1670_v54  ;;  %v1797_v62 = vpop.f32.mrb[19].mxu0  ;;  %v1800_v3 = vmul.f32 %v1792_v4, %v5016_v51 }
 0x52a   : > { %v5127_v63 = vadd.f32 %v1797_v62, %v1674_v53 }
 0x52b   : > { %v1801_v5 = vmul.f32 %v1796_v61, %v5019_v52 }
 0x52d   : > { %v1802_v7 = vpack.c.bf16 %v1801_v5, %v1800_v3 }
 0x52f   : > { %3527 = vmatmul.mubr.bf16.vlgmr.msra.gmra.mrb[16].mxu1 %v1802_v7 }
 0x530   : > { %2098 = vmatpush1.bf16.msra.mxu1 %v4031_v6  ;;  %2129 = vmatprep.mubr.bf16.mxu1 %v4481_v1 }
 0x531   : > { %2099 = vmatprep.subr.bf16.mxu1 %v4036_v8 }
 0x534   : > { %2100 = vmatpush1.bf16.msra.mxu1 %v4034_v9 }
 0x535   : > { %2101 = vmatprep.subr.bf16.mxu1 %v4039_v10 }
 0x538   : > { %2102 = vmatpush1.bf16.msra.mxu1 %v4037_v12  ;;  %v4055_v12 = vld [vmem:[#allocation7 + $0x100] sm:$0xff]  }
 0x539   : > { %2103 = vmatprep.subr.bf16.mxu1 %v4042_v14 }
 0x53c   : > { %2104 = vmatpush1.bf16.msra.mxu1 %v4040_v16  ;;  %v4056_v16 = vld [vmem:[#allocation7 + $0x108] sm:$0xff]  }
 0x53d   : > { %2105 = vmatprep.subr.bf16.mxu1 %v4045_v17  ;;  %v4057_v17 = vld [vmem:[#allocation7 + $0x110] sm:$0xff]  }
 0x540   : > { %2106 = vmatpush1.bf16.msra.mxu1 %v4043_v19  ;;  %v4058_v19 = vld [vmem:[#allocation7 + $0x118] sm:$0xff]  }
 0x541   : > { %2107 = vmatprep.subr.bf16.mxu1 %v4048_v20  ;;  %v4059_v20 = vld [vmem:[#allocation7 + $0x120] sm:$0xff]  }
 0x544   : > { %2108 = vmatpush1.bf16.msra.mxu1 %v4046_v21  ;;  %v4060_v21 = vld [vmem:[#allocation7 + $0x128] sm:$0xff]  }
 0x545   : > { %2109 = vmatprep.subr.bf16.mxu1 %v4051_v22  ;;  %v4061_v22 = vld [vmem:[#allocation7 + $0x130] sm:$0xff]  }
 0x546   : > { %v1961_v26 = vpop.f32.mrb[20].mxu0 }
 0x547   : > { %v1962_v27 = vadd.f32 %v3203_v23, %v1961_v26  ;;  %v3548_v28 = vpop.f32.mrb[21].mxu0  ;;  %v3213_v26 = vld [vmem:[%s5420_s20 + $0x6] sm:$0x3] }
 0x548   : > { %v1964_v29 = vpop.f32.mrb[22].mxu0  ;;  %2110 = vmatpush1.bf16.msra.mxu1 %v4049_v24  ;;  %v4063_v24 = vld [vmem:[%s4882_s24 + $0x10] ss:$20 sps:$4 sm:$0xff]   ;;  %v2014_v28 = vrot.slane %v3213_v26, %v4952_v60  ;;  %s2918_s24 = sshll.u32 %s586_s9, 4  ;;  %s5309_s24 = int_to_ptr.vmem [resolvable:$true] %s2918_s24 }
 0x549   : > { %v1970_v31 = vmul.f32 0.044715, %v1962_v27  ;;  %v1965_v36 = vadd.f32 %v3203_v23, %v1964_v29  ;;  %v3549_v37 = vpop.f32.mrb[23].mxu0  ;;  %2111 = vmatprep.subr.bf16.mxu1 %v4054_v25  ;;  %v1968_v6 = vmul.f32 0.5, %v1962_v27  ;;  %v4062_v23 = vld [vmem:[#allocation7 + $0x138] sm:$0xff]   ;;  %s4377_s0 = scalar_lea.vmem %s5309_s24, 256  ;;  %p4384_p5 = scmp.lt.s32.totalorder %s5309_s24, %s4382_s30 }
 0x54a   : > { %p4378_p7 = scmp.ne.s32.totalorder %s5309_s24, %s4377_s0  ;;  %p4385_p8 = scmp.lt.s32.totalorder %s4383_s11, %s4377_s0 }
 0x54b   : > { %v1972_v42 = vmul.f32 %v1970_v31, %v1962_v27  ;;  %v1971_v2 = vmul.f32 0.044715, %v1965_v36  ;;  %v1969_v7 = vmul.f32 0.5, %v1965_v36 }
 0x54c   : > { %2112 = vmatpush1.bf16.msra.mxu1 %v4052_v30  ;;  %p4379_p0 = pnand %p4378_p7, %p5424_p9  ;;  %p4386_p4 = por %p4385_p8, %p4384_p5 }
 0x54d   : > { %v1974_v54 = vmul.f32 %v1972_v42, %v1962_v27  ;;  %v1973_v53 = vmul.f32 %v1971_v2, %v1965_v36  ;;  %3570 = vmatprep.subr.bf16.mxu1 %v4479_v0 }
 0x54e   : > { %p4380_p2 = pneg %p4379_p0 }
 0x54f   : > { %v1976_v56 = vadd.f32 %v1974_v54, %v1962_v27  ;;  %v1975_v4 = vmul.f32 %v1973_v53, %v1965_v36  ;;  %v2010_v27 = vrot.slane %v3213_v26, %v5008_v38  ;;  %v4064_v53 = vld [vmem:[#allocation8 + $0x200] ss:$8 sps:$4 sm:$0xff]  }
 0x550   : > { %p4387_p3 = pnand %p4386_p4, %p4380_p2 }
 0x551   : > { %v1978_v57 = vmul.f32 0.7978846, %v1976_v56  ;;  %v1977_v59 = vadd.f32 %v1975_v4, %v1965_v36  ;;  %v4069_v4 = vld [vmem:[#allocation8 + $0x214] ss:$8 sps:$4 sm:$0xff]  }
 0x553   : > { %4108 = vtanh.f32 %v1978_v57  ;;  %v1979_v61 = vmul.f32 0.7978846, %v1977_v59  ;;  %v4067_v57 = vld [vmem:[#allocation8 + $0x210] ss:$8 sps:$4 sm:$0xff]   ;;  %v4072_v59 = vld [vmem:[#allocation8 + $0x224] ss:$8 sps:$4 sm:$0xff]  }
 0x555   : > { %4110 = vtanh.f32 %v1979_v61  ;;  %v4070_v61 = vld [vmem:[#allocation8 + $0x220] ss:$8 sps:$4 sm:$0xff]  }
 0x55d   : > { %v4109_v62 = vpop.eup %4108 }
 0x55e   : > { %v1982_v3 = vadd.f32 1.0, %v4109_v62  ;;  %v4075_v62 = vld [vmem:[#allocation8 + $0x234] ss:$8 sps:$4 sm:$0xff]  }
 0x55f   : > { %v4111_v5 = vpop.eup %4110 }
 0x560   : > { %v1983_v8 = vadd.f32 1.0, %v4111_v5  ;;  %v1984_v9 = vmul.f32 %v1982_v3, %v1968_v6  ;;  %v4073_v3 = vld [vmem:[#allocation8 + $0x230] ss:$8 sps:$4 sm:$0xff]   ;;  %v4078_v5 = vld [vmem:[#allocation8 + $0x244] ss:$8 sps:$4 sm:$0xff]  }
 0x561   : > { %v4076_v6 = vld [vmem:[#allocation8 + $0x240] ss:$8 sps:$4 sm:$0xff]  }
 0x562   : > { %v1985_v10 = vmul.f32 %v1983_v8, %v1969_v7  ;;  %v4081_v7 = vld [vmem:[#allocation8 + $0x254] ss:$8 sps:$4 sm:$0xff]   ;;  %v4079_v8 = vld [vmem:[#allocation8 + $0x250] ss:$8 sps:$4 sm:$0xff]  }
 0x564   : > { %v1986_v14 = vpack.c.bf16 %v1985_v10, %v1984_v9  ;;  %v4084_v9 = vld [vmem:[#allocation8 + $0x264] ss:$8 sps:$4 sm:$0xff]   ;;  %v4082_v10 = vld [vmem:[#allocation8 + $0x260] ss:$8 sps:$4 sm:$0xff]  }
 0x566   : > { %2130 = vmatmul.mubr.bf16.vlgmr.msra.gmra.mrb[20].mxu1 %v1986_v14 }
 0x567   : > { %3571 = vmatpush3.bf16.msra.mxu1 %v4055_v12  ;;  %3586 = vmatprep.mubr.msk.bf16.mxu1 %vm4480_vm0, %v4479_v0  ;;  %v4087_v12 = vld [vmem:[#allocation8 + $0x274] ss:$8 sps:$4 sm:$0xff]  }
 0x568   : > { %3572 = vmatprep.subr.bf16.mxu1 %v4479_v0 }
 0x56b   : > { %3573 = vmatpush3.bf16.msra.mxu1 %v4056_v16 }
 0x56c   : > { %3574 = vmatprep.subr.bf16.mxu1 %v4479_v0 }
 0x56f   : > { %3575 = vmatpush3.bf16.msra.mxu1 %v4057_v17 }
 0x570   : > { %3576 = vmatprep.subr.bf16.mxu1 %v4479_v0 }
 0x573   : > { %3577 = vmatpush3.bf16.msra.mxu1 %v4058_v19 }
 0x574   : > { %3578 = vmatprep.subr.bf16.mxu1 %v4479_v0 }
 0x577   : > { %3579 = vmatpush3.bf16.msra.mxu1 %v4059_v20  ;;  %v4085_v20 = vld [vmem:[#allocation8 + $0x270] ss:$8 sps:$4 sm:$0xff]  }
 0x578   : > { %3580 = vmatprep.subr.bf16.mxu1 %v4479_v0 }
 0x57b   : > { %3581 = vmatpush3.bf16.msra.mxu1 %v4060_v21 }
 0x57c   : > { %3582 = vmatprep.subr.bf16.mxu1 %v4479_v0 }
 0x57f   : > { %3583 = vmatpush3.bf16.msra.mxu1 %v4061_v22 }
 0x580   : > { %3584 = vmatprep.subr.bf16.mxu1 %v4479_v0 }
 0x583   : > { %3585 = vmatpush3.bf16.msra.mxu1 %v4062_v23 }
 0x584   : > { %3590 = vmatprep.subr.bf16.mxu1 %v4479_v0 }
 0x586   : > { %3587 = vmatmul.mubr.bf16.vlgmr.msra.gmra.mrb[24].mxu1 %v4063_v24 }
 0x587   : > { %3591 = vmatpush3.bf16.msra.mxu1 %v4922_v44  ;;  %3606 = vmatprep.mubr.msk.bf16.mxu1 %vm4480_vm0, %v4479_v0  ;;  %v4066_v44 = vld [vmem:[#allocation8 + $0x204] ss:$8 sps:$4 sm:$0xff]  }
 0x588   : > { %3592 = vmatprep.subr.bf16.mxu1 %v4479_v0  ;;  %2437 = vmatprep.subr.bf16.mxu0 %v4066_v44 }
 0x58b   : > { %3593 = vmatpush3.bf16.msra.mxu1 %v4925_v45 }
 0x58c   : > { %3594 = vmatprep.subr.bf16.mxu1 %v4479_v0 }
 0x58f   : > { %3595 = vmatpush3.bf16.msra.mxu1 %v4929_v46 }
 0x590   : > { %3596 = vmatprep.subr.bf16.mxu1 %v4479_v0 }
 0x593   : > { %3597 = vmatpush3.bf16.msra.mxu1 %v4933_v47 }
 0x594   : > { %3598 = vmatprep.subr.bf16.mxu1 %v4479_v0 }
 0x597   : > { %3599 = vmatpush3.bf16.msra.mxu1 %v4937_v48 }
 0x598   : > { %3600 = vmatprep.subr.bf16.mxu1 %v4479_v0 }
 0x59b   : > { %3601 = vmatpush3.bf16.msra.mxu1 %v4941_v49 }
 0x59c   : > { %3602 = vmatprep.subr.bf16.mxu1 %v4479_v0 }
 0x59f   : > { %3603 = vmatpush3.bf16.msra.mxu1 %v4994_v34 }
 0x5a0   : > { %3604 = vmatprep.subr.bf16.mxu1 %v4479_v0 }
 0x5a3   : > { %3605 = vmatpush3.bf16.msra.mxu1 %v5000_v35 }
 0x602   : > { %v1837_v45 = vpop.f32.mrb[16].mxu1 }
 0x603   : > { %v5164_v46 = vmul.f32 0.5, %v1837_v45  ;;  %v3528_v47 = vpop.f32.mrb[17].mxu1 }
 0x604   : > { %v1840_v25 = vpop.f32.mrb[18].mxu1 }
 0x605   : > { %v5170_v48 = vmax.f32 %v2526_v40, %v5164_v46  ;;  %v5172_v49 = vmul.f32 0.5, %v1840_v25  ;;  %v3529_v34 = vpop.f32.mrb[19].mxu1 }
 0x607   : > { %v5178_v35 = vmax.f32 %v2527_v50, %v5172_v49 }
 0x639   : > { %v2131_v29 = vpop.f32.mrb[20].mxu1 }
 0x63a   : > { %v2132_v40 = vadd.f32 %v2131_v29, %v2010_v27  ;;  %v2133_v30 = vpop.f32.mrb[21].mxu1 }
 0x63b   : > { %v5185_v31 = vadd.f32 %v2133_v30, %v2014_v28  ;;  %v2135_v36 = vpop.f32.mrb[22].mxu1 }
 0x63c   : > { %v2136_v37 = vadd.f32 %v2135_v36, %v2010_v27  ;;  %v2137_v42 = vpop.f32.mrb[23].mxu1  ;;  %v2140_v50 = vmul.f32 %v2132_v40, %v5016_v51 }
 0x63d   : > { %v5187_v2 = vadd.f32 %v2137_v42, %v2014_v28 }
 0x63e   : > { %v2141_v54 = vmul.f32 %v2136_v37, %v5019_v52 }
 0x640   : > { %v2142_v56 = vpack.c.bf16 %v2141_v54, %v2140_v50 }
 0x642   : > { %3567 = vmatmul.mubr.bf16.vlgmr.msra.gmra.mrb[24].mxu0 %v2142_v56 }
 0x643   : > { %2438 = vmatpush1.bf16.msra.mxu0 %v4064_v53  ;;  %2469 = vmatprep.mubr.bf16.mxu0 %v4481_v1  ;;  %v3231_v1 = vld [vmem:[%s5356_s3 + $0x4] ss:$0 sm:$0xff] }
 0x644   : > { %2439 = vmatprep.subr.bf16.mxu0 %v4069_v4 }
 0x647   : > { %2440 = vmatpush1.bf16.msra.mxu0 %v4067_v57 }
 0x648   : > { %2441 = vmatprep.subr.bf16.mxu0 %v4072_v59 }
 0x64b   : > { %2442 = vmatpush1.bf16.msra.mxu0 %v4070_v61 }
 0x64c   : > { %2443 = vmatprep.subr.bf16.mxu0 %v4075_v62 }
 0x64f   : > { %2444 = vmatpush1.bf16.msra.mxu0 %v4073_v3 }
 0x650   : > { %2445 = vmatprep.subr.bf16.mxu0 %v4078_v5 }
 0x653   : > { %2446 = vmatpush1.bf16.msra.mxu0 %v4076_v6  ;;  %v3241_v6 = vld [vmem:[%s5420_s20 + $0x8] sm:$0x3] }
 0x654   : > { %2447 = vmatprep.subr.bf16.mxu0 %v4081_v7  ;;  %v2350_v7 = vrot.slane %v3241_v6, %v5008_v38  ;;  %v4089_v38 = vld [vmem:[#allocation11 + $0x8] sm:$0xff]  }
 0x657   : > { %2448 = vmatpush1.bf16.msra.mxu0 %v4079_v8  ;;  %v2354_v8 = vrot.slane %v3241_v6, %v4952_v60  ;;  %v622_v6 = vld [vmem:[#allocation14 + $0x68] sm:$0xff] }
 0x658   : > { %2449 = vmatprep.subr.bf16.mxu0 %v4084_v9 }
 0x659   : > { %v2301_v14 = vpop.f32.mrb[24].mxu1 }
 0x65a   : > { %v2302_v16 = vadd.f32 %v3231_v1, %v2301_v14  ;;  %v3588_v17 = vpop.f32.mrb[25].mxu1 }
 0x65b   : > { %v2304_v19 = vpop.f32.mrb[26].mxu1  ;;  %2450 = vmatpush1.bf16.msra.mxu0 %v4082_v10 }
 0x65c   : > { %v2310_v21 = vmul.f32 0.044715, %v2302_v16  ;;  %v2305_v22 = vadd.f32 %v3231_v1, %v2304_v19  ;;  %v3589_v23 = vpop.f32.mrb[27].mxu1  ;;  %2451 = vmatprep.subr.bf16.mxu0 %v4087_v12  ;;  %v2308_v36 = vmul.f32 0.5, %v2302_v16 }
 0x65d   : > { %v4088_v23 = vld [vmem:[#allocation11] sm:$0xff]  }
 0x65e   : > { %v2312_v24 = vmul.f32 %v2310_v21, %v2302_v16  ;;  %v2311_v44 = vmul.f32 0.044715, %v2305_v22  ;;  %v2309_v37 = vmul.f32 0.5, %v2305_v22 }
 0x65f   : > { %2452 = vmatpush1.bf16.msra.mxu0 %v4085_v20 }
 0x660   : > { %v2314_v45 = vmul.f32 %v2312_v24, %v2302_v16  ;;  %v2313_v47 = vmul.f32 %v2311_v44, %v2305_v22  ;;  %3610 = vmatprep.subr.bf16.mxu0 %v4479_v0  ;;  %v4090_v24 = vld [vmem:[#allocation11 + $0x10] sm:$0xff]   ;;  %v4091_v44 = vld [vmem:[#allocation11 + $0x18] sm:$0xff]  }
 0x662   : > { %v2316_v25 = vadd.f32 %v2314_v45, %v2302_v16  ;;  %v2315_v34 = vmul.f32 %v2313_v47, %v2305_v22  ;;  %v4094_v45 = vld [vmem:[#allocation11 + $0x30] sm:$0xff]   ;;  %v4095_v47 = vld [vmem:[#allocation11 + $0x38] sm:$0xff]  }
 0x664   : > { %v2318_v26 = vmul.f32 0.7978846, %v2316_v25  ;;  %v2317_v27 = vadd.f32 %v2315_v34, %v2305_v22  ;;  %v609_v25 = vld [vmem:[#allocation14] sm:$0xff]  ;;  %v610_v34 = vld [vmem:[#allocation14 + $0x8] sm:$0xff] }
 0x666   : > { %4112 = vtanh.f32 %v2318_v26  ;;  %v2319_v28 = vmul.f32 0.7978846, %v2317_v27  ;;  %v5224_v26 = vpack.c.bf16 %v610_v34, %v609_v25  ;;  %v611_v27 = vld [vmem:[#allocation14 + $0x10] sm:$0xff] }
 0x668   : > { %4114 = vtanh.f32 %v2319_v28  ;;  %v612_v28 = vld [vmem:[#allocation14 + $0x18] sm:$0xff]  ;;  %3701 = vmatprep.subr.bf16.mxu1 %v5224_v26 }
 0x670   : > { %v4113_v29 = vpop.eup %4112 }
 0x671   : > { %v2322_v40 = vadd.f32 1.0, %v4113_v29  ;;  %v5226_v29 = vpack.c.bf16 %v612_v28, %v611_v27 }
 0x672   : > { %v4115_v30 = vpop.eup %4114 }
 0x673   : > { %v2323_v42 = vadd.f32 1.0, %v4115_v30  ;;  %v2324_v50 = vmul.f32 %v2322_v40, %v2308_v36  ;;  %v613_v40 = vld [vmem:[#allocation14 + $0x20] sm:$0xff]  ;;  %v614_v30 = vld [vmem:[#allocation14 + $0x28] sm:$0xff]  ;;  %v615_v36 = vld [vmem:[#allocation14 + $0x30] sm:$0xff] }
 0x675   : > { %v2325_v54 = vmul.f32 %v2323_v42, %v2309_v37  ;;  %v616_v37 = vld [vmem:[#allocation14 + $0x38] sm:$0xff] }
 0x676   : > { %v5236_v42 = vpack.c.bf16 %v616_v37, %v615_v36 }
 0x677   : > { %v2326_v53 = vpack.c.bf16 %v2325_v54, %v2324_v50  ;;  %v617_v50 = vld [vmem:[#allocation14 + $0x40] sm:$0xff]  ;;  %v618_v54 = vld [vmem:[#allocation14 + $0x48] sm:$0xff] }
 0x679   : > { %2470 = vmatmul.mubr.bf16.vlgmr.msra.gmra.mrb[28].mxu0 %v2326_v53  ;;  %v5240_v53 = vpack.c.bf16 %v618_v54, %v617_v50 }
 0x67a   : > { %3626 = vmatprep.mubr.msk.bf16.mxu0 %vm4480_vm0, %v4479_v0  ;;  %3611 = vmatpush3.bf16.msra.mxu0 %v4088_v23 }
 0x67b   : > { %3612 = vmatprep.subr.bf16.mxu0 %v4479_v0 }
 0x67e   : > { %3613 = vmatpush3.bf16.msra.mxu0 %v4089_v38 }
 0x67f   : > { %3614 = vmatprep.subr.bf16.mxu0 %v4479_v0 }
 0x682   : > { %3615 = vmatpush3.bf16.msra.mxu0 %v4090_v24 }
 0x683   : > { %3616 = vmatprep.subr.bf16.mxu0 %v4479_v0 }
 0x686   : > { %3617 = vmatpush3.bf16.msra.mxu0 %v4091_v44 }
 0x687   : > { %3618 = vmatprep.subr.bf16.mxu0 %v4479_v0 }
 0x715   : > { %v2177_v56 = vpop.f32.mrb[24].mxu0 }
 0x716   : > { %v5198_v4 = vmul.f32 0.5, %v2177_v56  ;;  %v3568_v57 = vpop.f32.mrb[25].mxu0  ;;  %v619_v56 = vld [vmem:[#allocation14 + $0x50] sm:$0xff] }
 0x717   : > { %v2180_v59 = vpop.f32.mrb[26].mxu0  ;;  %v620_v57 = vld [vmem:[#allocation14 + $0x58] sm:$0xff] }
 0x718   : > { %v2530_v61 = vmax.f32 %v5170_v48, %v5198_v4  ;;  %v5202_v62 = vmul.f32 0.5, %v2180_v59  ;;  %v3569_v3 = vpop.f32.mrb[27].mxu0  ;;  %v5244_v59 = vpack.c.bf16 %v620_v57, %v619_v56 }
 0x719   : > { %v621_v3 = vld [vmem:[#allocation14 + $0x60] sm:$0xff] }
 0x71a   : > { %v2531_v5 = vmax.f32 %v5178_v35, %v5202_v62 }
 0x74c   : > { %v2471_v9 = vpop.f32.mrb[28].mxu0 }
 0x74d   : > { %v2472_v1 = vadd.f32 %v2471_v9, %v2350_v7  ;;  %v2473_v10 = vpop.f32.mrb[29].mxu0 }
 0x74e   : > { %v5211_v12 = vadd.f32 %v2473_v10, %v2354_v8  ;;  %v2475_v14 = vpop.f32.mrb[30].mxu0 }
 0x74f   : > { %v2476_v16 = vadd.f32 %v2475_v14, %v2350_v7  ;;  %v2477_v17 = vpop.f32.mrb[31].mxu0  ;;  %v2480_v20 = vmul.f32 %v2472_v1, %v5016_v51  ;;  %v4092_v51 = vld [vmem:[#allocation11 + $0x20] sm:$0xff]   ;;  %v5248_v7 = vpack.c.bf16 %v622_v6, %v621_v3 }
 0x750   : > { %v5213_v19 = vadd.f32 %v2477_v17, %v2354_v8  ;;  %3619 = vmatpush3.bf16.msra.mxu0 %v4092_v51 }
 0x751   : > { %v2481_v21 = vmul.f32 %v2476_v16, %v5019_v52  ;;  %v4093_v52 = vld [vmem:[#allocation11 + $0x28] sm:$0xff]   ;;  %3620 = vmatprep.subr.bf16.mxu0 %v4479_v0 }
 0x753   : > { %v2482_v22 = vpack.c.bf16 %v2481_v21, %v2480_v20 }
 0x754   : > { %3621 = vmatpush3.bf16.msra.mxu0 %v4093_v52 }
 0x755   : > { %3607 = vmatmul.mubr.bf16.vlgmr.msra.gmra.mrb[28].mxu1 %v2482_v22  ;;  %3622 = vmatprep.subr.bf16.mxu0 %v4479_v0 }
 0x756   : > { %3703 = vmatpush3.bf16.msra.mxu1 %v5224_v26 }
 0x757   : > { %3705 = vmatprep.subr.bf16.mxu1 %v5226_v29 }
 0x758   : > { %3623 = vmatpush3.bf16.msra.mxu0 %v4094_v45 }
 0x759   : > { %3624 = vmatprep.subr.bf16.mxu0 %v4479_v0  ;;  %v5232_v0 = vpack.c.bf16 %v614_v30, %v613_v40 }
 0x75a   : > { %3707 = vmatpush3.bf16.msra.mxu1 %v5226_v29 }
 0x75b   : > { %3709 = vmatprep.subr.bf16.mxu1 %v5232_v0 }
 0x75c   : > { %3625 = vmatpush3.bf16.msra.mxu0 %v4095_v47 }
 0x75d   : > { %3733 = vmatprep.subr.bf16.mxu0 %v5224_v26 }
 0x75e   : > { %3711 = vmatpush3.bf16.msra.mxu1 %v5232_v0 }
 0x75f   : > { %3713 = vmatprep.subr.bf16.mxu1 %v5236_v42 }
 0x762   : > { %3715 = vmatpush3.bf16.msra.mxu1 %v5236_v42 }
 0x763   : > { %3717 = vmatprep.subr.bf16.mxu1 %v5240_v53 }
 0x766   : > { %3719 = vmatpush3.bf16.msra.mxu1 %v5240_v53 }
 0x767   : > { %3721 = vmatprep.subr.bf16.mxu1 %v5244_v59 }
 0x76a   : > { %3723 = vmatpush3.bf16.msra.mxu1 %v5244_v59 }
 0x76b   : > { %3725 = vmatprep.subr.bf16.mxu1 %v5248_v7 }
 0x76e   : > { %3727 = vmatpush3.bf16.msra.mxu1 %v5248_v7 }
 0x828   : > { %v2517_v8 = vpop.f32.mrb[28].mxu1 }
 0x829   : > { %v2524_v9 = vmul.f32 0.5, %v2517_v8  ;;  %v3608_v1 = vpop.f32.mrb[29].mxu1 }
 0x82a   : > { %v2520_v10 = vpop.f32.mrb[30].mxu1 }
 0x82b   : > { %v2532_v14 = vmax.f32 %v2530_v61, %v2524_v9  ;;  %v2525_v16 = vmul.f32 0.5, %v2520_v10  ;;  %v3609_v17 = vpop.f32.mrb[31].mxu1 }
 0x82d   : > { %v2534_v20 = vsub.f32 %v5107_v32, %v2532_v14  ;;  %v2540_v21 = vsub.f32 %v5109_v33, %v2532_v14  ;;  %v2546_v22 = vsub.f32 %v5164_v46, %v2532_v14  ;;  %v2552_v23 = vsub.f32 %v5198_v4, %v2532_v14 }
 0x82e   : > { %v2558_v38 = vsub.f32 %v2524_v9, %v2532_v14  ;;  %v2533_v24 = vmax.f32 %v2531_v5, %v2525_v16 }
 0x82f   : > { %v2536_v44 = vmul.f32 1.442695, %v2534_v20  ;;  %v2542_v51 = vmul.f32 1.442695, %v2540_v21  ;;  %v2548_v52 = vmul.f32 1.442695, %v2546_v22 }
 0x830   : > { %v2554_v48 = vmul.f32 1.442695, %v2552_v23  ;;  %v2560_v61 = vmul.f32 1.442695, %v2558_v38  ;;  %v2535_v45 = vsub.f32 %v5112_v39, %v2533_v24  ;;  %v2541_v32 = vsub.f32 %v5116_v41, %v2533_v24  ;;  %v4148_v39 = vld [vmem:[%s5420_s20] sm:$0x3] }
 0x831   : > { %4116 = vpow2.f32 %v2536_v44  ;;  %v2547_v33 = vsub.f32 %v5172_v49, %v2533_v24  ;;  %v2553_v46 = vsub.f32 %v5202_v62, %v2533_v24  ;;  %v2559_v4 = vsub.f32 %v2525_v16, %v2533_v24 }
 0x832   : > { %4118 = vpow2.f32 %v2542_v51  ;;  %v2538_v47 = vmul.f32 1.442695, %v2535_v45  ;;  %v2544_v35 = vmul.f32 1.442695, %v2541_v32  ;;  %v946_v41 = vrot.slane %v4148_v39, %v4952_v60 }
 0x833   : > { %4120 = vpow2.f32 %v2548_v52  ;;  %v2550_v5 = vmul.f32 1.442695, %v2547_v33  ;;  %v2556_v25 = vmul.f32 1.442695, %v2553_v46  ;;  %v2562_v34 = vmul.f32 1.442695, %v2559_v4 }
 0x834   : > { %4122 = vpow2.f32 %v2554_v48  ;;  %v1066_v49 = vadd.f32 %v5013_v43, %v946_v41  ;;  %v1070_v60 = vadd.f32 %v5021_v55, %v946_v41 }
 0x835   : > { %4124 = vpow2.f32 %v2560_v61 }
 0x836   : > { %4126 = vpow2.f32 %v2538_v47 }
 0x837   : > { %4128 = vpow2.f32 %v2544_v35 }
 0x838   : > { %4130 = vpow2.f32 %v2550_v5 }
 0x839   : > { %4132 = vpow2.f32 %v2556_v25 }
 0x83a   : > { %4134 = vpow2.f32 %v2562_v34 }
 0x83b   : > { %v4117_v62 = vpop.eup %4116 }
 0x83c   : > { %v4119_v27 = vpop.eup %4118  ;;  %v2564_v28 = vmul.f32 %v4117_v62, %v1066_v49 }
 0x83d   : > { %v4121_v40 = vpop.eup %4120  ;;  %v2566_v30 = vadd.f32 %v4119_v27, %v4117_v62  ;;  %v2568_v36 = vmul.f32 %v4119_v27, %v5067_v13 }
 0x83e   : > { %v4123_v37 = vpop.eup %4122  ;;  %v2574_v50 = vmul.f32 %v4121_v40, %v5125_v58 }
 0x83f   : > { %v4125_v54 = vpop.eup %4124  ;;  %v2572_v56 = vadd.f32 %v4121_v40, %v2566_v30  ;;  %v2570_v57 = vadd.f32 %v2568_v36, %v2564_v28  ;;  %v2580_v3 = vmul.f32 %v4123_v37, %v5185_v31  ;;  %v3266_v28 = vld [vmem:[%s5421_s19] ss:$0 sm:$0xff] }
 0x840   : > { %v4127_v6 = vpop.eup %4126  ;;  %v2586_v43 = vmul.f32 %v4125_v54, %v5211_v12  ;;  %v3267_v36 = vld [vmem:[%s5422_s8] ss:$0 sm:$0xff] }
 0x841   : > { %v4129_v8 = vpop.eup %4128  ;;  %v2578_v9 = vadd.f32 %v4123_v37, %v2572_v56  ;;  %v2565_v1 = vmul.f32 %v4127_v6, %v1070_v60  ;;  %v2576_v10 = vadd.f32 %v2574_v50, %v2570_v57 }
 0x842   : > { %v4131_v14 = vpop.eup %4130  ;;  %v2567_v16 = vadd.f32 %v4129_v8, %v4127_v6  ;;  %v2569_v13 = vmul.f32 %v4129_v8, %v5069_v18 }
 0x843   : > { %v4133_v17 = vpop.eup %4132  ;;  %v2584_v58 = vadd.f32 %v4125_v54, %v2578_v9  ;;  %v2575_v20 = vmul.f32 %v4131_v14, %v5127_v63  ;;  %v2582_v55 = vadd.f32 %v2580_v3, %v2576_v10 }
 0x844   : > { %v4135_v21 = vpop.eup %4134  ;;  %v2573_v22 = vadd.f32 %v4131_v14, %v2567_v16  ;;  %v2571_v23 = vadd.f32 %v2569_v13, %v2565_v1  ;;  %v2581_v31 = vmul.f32 %v4133_v17, %v5187_v2  ;;  %v623_v2 = vld [vmem:[#allocation14 + $0x70] sm:$0xff] }
 0x845   : > { %4136 = vrcp.f32 %v2584_v58  ;;  %v2587_v12 = vmul.f32 %v4135_v21, %v5213_v19  ;;  %v2588_v38 = vadd.f32 %v2586_v43, %v2582_v55  ;;  %v624_v19 = vld [vmem:[#allocation14 + $0x78] sm:$0xff] }
 0x846   : > { %v2579_v24 = vadd.f32 %v4133_v17, %v2573_v22  ;;  %v2577_v44 = vadd.f32 %v2575_v20, %v2571_v23 }
 0x848   : > { %v2585_v51 = vadd.f32 %v4135_v21, %v2579_v24  ;;  %v2583_v52 = vadd.f32 %v2581_v31, %v2577_v44 }
 0x84a   : > { %4138 = vrcp.f32 %v2585_v51  ;;  %v2589_v18 = vadd.f32 %v2587_v12, %v2583_v52 }
 0x84f   : > { %v4137_v48 = vpop.eup %4136 }
 0x850   : > { %v2591_v61 = vmul.f32 %v4137_v48, %v2588_v38 }
 0x854   : > { %v4139_v45 = vpop.eup %4138 }
 0x855   : > { %v2593_v63 = vmul.f32 %v4139_v45, %v2589_v18 }
 0x857   : > { %v2594_v32 = vpack.c.bf16 %v2593_v63, %v2591_v61 }
 0x859   : > { %3627 = vmatmul.mubr.bf16.vlgmr.msra.gmra.mrb[32].mxu0 %v2594_v32 }
 0x85a   : > { %3735 = vmatpush3.bf16.msra.mxu0 %v5224_v26  ;;  %v3728_v26 = vpack.c.bf16 %v624_v19, %v623_v2 }
 0x85b   : > { %3737 = vmatprep.subr.bf16.mxu0 %v5226_v29 }
 0x85c   : > { %3729 = vmatprep.subr.bf16.mxu1 %v3728_v26 }
 0x85d   : > { %3731 = vmatpush3.bf16.msra.mxu1 %v3728_v26 }
 0x85e   : > { %3739 = vmatpush3.bf16.msra.mxu0 %v5226_v29 }
 0x85f   : > { %3741 = vmatprep.subr.bf16.mxu0 %v5232_v0 }
 0x862   : > { %3743 = vmatpush3.bf16.msra.mxu0 %v5232_v0 }
 0x863   : > { %3745 = vmatprep.subr.bf16.mxu0 %v5236_v42 }
 0x866   : > { %3747 = vmatpush3.bf16.msra.mxu0 %v5236_v42 }
 0x867   : > { %3749 = vmatprep.subr.bf16.mxu0 %v5240_v53 }
 0x86a   : > { %3751 = vmatpush3.bf16.msra.mxu0 %v5240_v53 }
 0x86b   : > { %3753 = vmatprep.subr.bf16.mxu0 %v5244_v59 }
 0x86e   : > { %3755 = vmatpush3.bf16.msra.mxu0 %v5244_v59 }
 0x86f   : > { %3757 = vmatprep.subr.bf16.mxu0 %v5248_v7 }
 0x872   : > { %3759 = vmatpush3.bf16.msra.mxu0 %v5248_v7 }
 0x873   : > { %3761 = vmatprep.subr.bf16.mxu0 %v3728_v26 }
 0x876   : > { %3763 = vmatpush3.bf16.msra.mxu0 %v3728_v26 }
 0x92c   : > { %v2693_v29 = vpop.f32.mrb[32].mxu0 }
 0x92d   : > { %v2700_v0 = vadd.f32 %v2693_v29, %v4963_v11  ;;  %v3628_v42 = vpop.f32.mrb[33].mxu0 }
 0x92e   : > { %v2696_v53 = vpop.f32.mrb[34].mxu0 }
 0x92f   : > { %v2701_v33 = vadd.f32 %v2696_v53, %v4967_v15  ;;  %v3629_v46 = vpop.f32.mrb[35].mxu0  ;;  %3662 = vmatprep.mubr.f32.mxu1 %v2700_v0  ;;  %v2777_v59 = vmul.f32 %v2700_v0, %v2700_v0 }
 0x931   : > { %v2778_v4 = vmul.f32 %v2701_v33, %v2701_v33  ;;  %3663 = vmatmul.mubr.f32.vlgmr.msra.gmra.mrb[32].mxu1 %v2701_v33  ;;  %3697 = vmatprep.mubr.f32.mxu0 %v2777_v59 }
 0x933   : > { %3698 = vmatmul.mubr.f32.vlgmr.msra.gmra.mrb[36].mxu0 %v2778_v4 }
 0xa04   : > { %v3664_v7 = vpop.f32.mrb[32].mxu1 }
 0xa05   : > { %v2855_v47 = vmul.f32 %v3664_v7, %v3664_v7  ;;  %v2768_v35 = vpop.f32.mrb[33].mxu1  ;;  %v2859_v15 = vsub.f32 %v2701_v33, %v3664_v7 }
 0xa06   : > { %v2854_v5 = vmul.f32 %v2768_v35, %v2768_v35  ;;  %v3699_v25 = vpop.f32.mrb[36].mxu0  ;;  %v2858_v27 = vsub.f32 %v2700_v0, %v2768_v35 }
 0xa07   : > { %v2857_v39 = vsub.f32 %v3699_v25, %v2855_v47  ;;  %v2845_v41 = vpop.f32.mrb[37].mxu0 }
 0xa08   : > { %v2856_v34 = vsub.f32 %v2845_v41, %v2854_v5 }
 0xa09   : > { %v2861_v11 = vadd.f32 1e-05, %v2857_v39 }
 0xa0a   : > { %v2860_v49 = vadd.f32 1e-05, %v2856_v34 }
 0xa0b   : > { %4140 = vrsqrt.f32 %v2861_v11 }
 0xa0c   : > { %4142 = vrsqrt.f32 %v2860_v49 }
 0xa15   : > { %v4141_v62 = vpop.eup %4140 }
 0xa16   : > { %v4143_v40 = vpop.eup %4142  ;;  %v2865_v30 = vmul.f32 %v4141_v62, %v2859_v15 }
 0xa17   : > { %v2864_v37 = vmul.f32 %v4143_v40, %v2858_v27 }
 0xa18   : > { %v2874_v50 = vmul.f32 %v3266_v28, %v2865_v30 }
 0xa19   : > { %v2873_v54 = vmul.f32 %v3266_v28, %v2864_v37 }
 0xa1a   : > { %v2883_v60 = vadd.f32 %v3267_v36, %v2874_v50 }
 0xa1b   : > { %v2882_v56 = vadd.f32 %v3267_v36, %v2873_v54 }
 0xa1c   : > { %v2887_v57 = vmul.f32 0.044715, %v2883_v60  ;;  %v2885_v58 = vmul.f32 0.5, %v2883_v60 }
 0xa1d   : > { %v2886_v3 = vmul.f32 0.044715, %v2882_v56  ;;  %v2884_v55 = vmul.f32 0.5, %v2882_v56 }
 0xa1e   : > { %v2889_v6 = vmul.f32 %v2887_v57, %v2883_v60 }
 0xa1f   : > { %v2888_v43 = vmul.f32 %v2886_v3, %v2882_v56 }
 0xa20   : > { %v2891_v8 = vmul.f32 %v2889_v6, %v2883_v60 }
 0xa21   : > { %v2890_v9 = vmul.f32 %v2888_v43, %v2882_v56 }
 0xa22   : > { %v2893_v1 = vadd.f32 %v2891_v8, %v2883_v60 }
 0xa23   : > { %v2892_v10 = vadd.f32 %v2890_v9, %v2882_v56 }
 0xa24   : > { %v2895_v14 = vmul.f32 0.7978846, %v2893_v1 }
 0xa25   : > { %v2894_v16 = vmul.f32 0.7978846, %v2892_v10 }
 0xa26   : > { %4144 = vtanh.f32 %v2895_v14 }
 0xa27   : > { %4146 = vtanh.f32 %v2894_v16 }
 0xa30   : > { %v4145_v13 = vpop.eup %4144 }
 0xa31   : > { %v4147_v17 = vpop.eup %4146  ;;  %v2899_v20 = vadd.f32 1.0, %v4145_v13 }
 0xa32   : > { %v2898_v21 = vadd.f32 1.0, %v4147_v17 }
 0xa33   : > { %v2901_v22 = vmul.f32 %v2899_v20, %v2885_v58 }
 0xa34   : > { %v2900_v23 = vmul.f32 %v2898_v21, %v2884_v55 }
 0xa35   : > { %2903 = vst [vmem:[%s586_s9 + $0x8] sm:$0xff] %v2901_v22 }
 0xa36   : > { %2902 = vst [vmem:[%s586_s9] sm:$0xff] %v2900_v23 }
 0xa37   : > { %4390 = shalt.err (!%p4387_p3)
}
 0xa38   : > { %s4391_s23 = scalar_lea.hbm %s5307_s18, 256  ;;  %s4395_s17 = scalar_lea.hbm %s5423_s4, 512 }
 0xa39   : > { %p4392_p10 = scmp.ne.s32.totalorder %s5307_s18, %s4391_s23  ;;  %p4396_p12 = scmp.lt.u32.totalorder %s5307_s18, %s5423_s4 }
 0xa3a   : > { %p4397_p6 = scmp.lt.u32.totalorder %s4395_s17, %s4391_s23  ;;  %p4399_p7 = scmp.lt.u32.totalorder %s4391_s23, %s5307_s18 }
 0xa3b   : > { %p4393_p1 = pnand %p4392_p10, %p5424_p9 }
 0xa3c   : > { %p4398_p13 = por %p4397_p6, %p4396_p12 }
 0xa3d   : > { %p4394_p11 = pneg %p4393_p1 }
 0xa3e   : > { %p4400_p0 = por %p4399_p7, %p4398_p13 }
 0xa40   : > { %p4401_p2 = pnand %p4400_p0, %p4394_p11 }
 0xa42   : > { %4404 = shalt.err (!%p4401_p2)
}
 0xa43   : > { %s4483_s10 = smov 128   ;;  %s4484_s9 = smov 8  }
 0xa44   : > { %3795 = dma.vmem_to_hbm [thread:$0]  (%p5424_p9), %s5309_s24, 256, %s5307_s18, %s2905_s14, %s4483_s10, %s4483_s10, %s4484_s9  }
 0xa45 PF: > { %s2933_s6 = sand.u32 1, %s4451_s25   ;;  %p5425_p5 = scmp.ne.s32.totalorder %s5405_s7, 0 }
 0xa46   : > { %p5426_p8 = scmp.ge.s32.totalorder %s4463_s28, 2  ;;  %s2934_s5 = scalar_lea.sflag [#allocation4], %s2933_s6 }
 0xa48   : > { %p3824_p4 = pnand %p5426_p8, %p5425_p5 }
 0xa4a   : > { %4446 = dma.done.wait (!%p3824_p4), %s2934_s5, 256  }
 0xa4b   : > { %4448 = vsyncadd (!%p3824_p4), %s2934_s5, 4294967040  ;;  %p32_p3 = scmp.ge.s32.totalorder %s4745_s16, 4   ;;  %s5427_s25 = smov %s4455_s26 }
 0xa4c   : > { %s5428_s26 = smov %s4459_s27  ;;  %s5429_s27 = smov %s4756_s21 }
 0xa4d   : > { %s5430_s28 = smov %s4745_s16  ;;  %34 = sbr.rel (!%p32_p3) target bundleno = 22 (0x16), region = 170 }
 0xa54   :  { %2939 = vsyncpa [#allocation3], 1 }
 0xa55   :  { %2941 = vsyncpa [#allocation3 + $0x1], 1 }
 0xa56   :  { %2942 = vsyncpa [#allocation6], 1 }
 0xa57   :  { %2944 = vsyncpa [#allocation6 + $0x1], 1 }
 0xa58   :  { %2945 = vsyncpa [#allocation9], 1 }
 0xa59   :  { %2946 = vsyncpa [#allocation12], 1 }
 0xa5a   :  { %2947 = vsyncpa [#allocation15], 1 }
 0xa5b   :  { %2948 = vsyncpa [#allocation4], 1 }
 0xa5c   :  { %2950 = vsyncpa [#allocation4 + $0x1], 1 }

</bundles_post_ra>
